<compile_context>
chip_gen: v5e
topology: v5e:2x2
jax: 0.10.0
libtpu: 0.0.40
codegen_flags: <defaults>
</compile_context>

<pallas_src>
import functools
import math

import jax
import jax.numpy as jnp
from jax import lax
from jax.experimental import pallas as pl
from jax.experimental.pallas import tpu as pltpu


def _round_up(x, m):
    return ((x + m - 1) // m) * m


def _gelu_tanh(x):
    # tanh-approximate GELU (runs on the EUP slot).  Max abs diff vs the exact
    # erf-based nn.GELU() is ~1e-3.
    c = 0.7978845608028654  # sqrt(2/pi)
    return 0.5 * x * (1.0 + jnp.tanh(c * (x + 0.044715 * (x * x * x))))


def _tst_encoder_kernel(x_ref, mask_ref,
                        wqkv_ref, wo_ref, bo_ref,
                        g1_ref, be1_ref,
                        w1_ref, b1_ref, w2_ref, b2_ref,
                        g2_ref, be2_ref,
                        out_ref,
                        *, n_layers, num_heads, d_k, d_v, eps):
    N = x_ref.shape[0]                    # N = B * L (folded into sublanes)
    hdk = num_heads * d_k
    scale = 1.0 / math.sqrt(d_k)
    inv_n = 1.0 / float(N)

    mask = mask_ref[...]                  # (N, N) combined additive mask
    x = x_ref[...]                        # (N, Dp) f32, lane-padded activations

    for layer in range(n_layers):         # layers fused: no HBM round-trips
        # ------------- multi-head self attention (fused QKV) -------------
        xb = x.astype(jnp.bfloat16)
        qkv = jnp.dot(xb, wqkv_ref[layer],
                      preferred_element_type=jnp.float32)      # (N, >=3*H*d_k)
        qkv_b = qkv.astype(jnp.bfloat16)

        ctx_parts = []
        for h in range(num_heads):        # heads unrolled: per-head math is tiny
            q_h = qkv_b[:, h * d_k:(h + 1) * d_k]
            k_h = qkv_b[:, hdk + h * d_k: hdk + (h + 1) * d_k]
            v_h = qkv_b[:, 2 * hdk + h * d_v: 2 * hdk + (h + 1) * d_v]
            # q @ k^T without an explicit transpose
            scores = lax.dot_general(q_h, k_h, (((1,), (1,)), ((), ())),
                                     preferred_element_type=jnp.float32)
            scores = scores * scale + mask
            scores = scores - jnp.max(scores, axis=-1, keepdims=True)
            p = jnp.exp(scores)
            attn = p * pl.reciprocal(jnp.sum(p, axis=-1, keepdims=True),
                                     approx=True)
            ctx_parts.append(jnp.dot(attn.astype(jnp.bfloat16), v_h,
                                     preferred_element_type=jnp.float32))
        ctx = jnp.concatenate(ctx_parts, axis=-1)               # (N, H*d_v)
        attn_out = jnp.dot(ctx.astype(jnp.bfloat16), wo_ref[layer],
                           preferred_element_type=jnp.float32) + bo_ref[layer]
        res1 = x + attn_out               # dropout_attn == identity

        # ------------- BatchNorm #1 (batch stats over N = B*L rows) ------
        mean1 = jnp.sum(res1, axis=0, keepdims=True) * inv_n
        c1 = res1 - mean1
        var1 = jnp.sum(c1 * c1, axis=0, keepdims=True) * inv_n  # centered form
        y1 = c1 * (lax.rsqrt(var1 + eps) * g1_ref[layer]) + be1_ref[layer]

        # ------------- position-wise feed-forward -------------
        h1 = jnp.dot(y1.astype(jnp.bfloat16), w1_ref[layer],
                     preferred_element_type=jnp.float32) + b1_ref[layer]
        h1 = _gelu_tanh(h1)
        ff = jnp.dot(h1.astype(jnp.bfloat16), w2_ref[layer],
                     preferred_element_type=jnp.float32) + b2_ref[layer]
        res2 = y1 + ff                    # dropout_ffn == identity

        # ------------- BatchNorm #2 -------------
        mean2 = jnp.sum(res2, axis=0, keepdims=True) * inv_n
        c2 = res2 - mean2
        var2 = jnp.sum(c2 * c2, axis=0, keepdims=True) * inv_n
        x = c2 * (lax.rsqrt(var2 + eps) * g2_ref[layer]) + be2_ref[layer]

    out_ref[...] = x


def _pad2(a, rows, cols, fill=0.0):
    r, c = a.shape
    return jnp.pad(a, ((0, rows - r), (0, cols - c)), constant_values=fill)


def _pack_layer_params(layer_params, *, model_dim, num_heads):
    d_k = model_dim // num_heads
    d_v = model_dim // num_heads
    d_ff = layer_params[0]["ff_w1"].shape[1]
    Dp = _round_up(model_dim, 128)
    Fp = _round_up(d_ff, 128)
    Qp = _round_up(3 * num_heads * d_k, 128)

    wqkv, wo, bo, g1, be1, w1, b1, w2, b2, g2, be2 = ([] for _ in range(11))
    for p in layer_params:
        qkv = jnp.concatenate([p["wq"], p["wk"], p["wv"]], axis=1)  # (D, 3*H*d_k)
        wqkv.append(_pad2(qkv, Dp, Qp).astype(jnp.bfloat16))
        wo.append(_pad2(p["wo"], num_heads * d_v, Dp).astype(jnp.bfloat16))
        bo.append(_pad2(p["bo"], 1, Dp))
        g1.append(_pad2(p["bn1_gamma"], 1, Dp, fill=1.0))
        be1.append(_pad2(p["bn1_beta"], 1, Dp))
        w1.append(_pad2(p["ff_w1"], Dp, Fp).astype(jnp.bfloat16))
        b1.append(_pad2(p["ff_b1"], 1, Fp))
        w2.append(_pad2(p["ff_w2"], Fp, Dp).astype(jnp.bfloat16))
        b2.append(_pad2(p["ff_b2"], 1, Dp))
        g2.append(_pad2(p["bn2_gamma"], 1, Dp, fill=1.0))
        be2.append(_pad2(p["bn2_beta"], 1, Dp))

    stack = lambda xs: jnp.stack(xs, axis=0)
    return tuple(stack(v) for v in (wqkv, wo, bo, g1, be1, w1, b1, w2, b2, g2, be2))


def tst_encoder(src, mask, layer_params, *, num_heads, eps=1e-5):
    """_TSTEncoder.forward: all layers fused into one pallas_call."""
    B, L, D = src.shape
    n_layers = len(layer_params)
    d_k = D // num_heads
    d_v = D // num_heads
    Dp = _round_up(D, 128)
    N = B * L

    # Fold (B, L, D) -> (B*L, Dp) lane-padded slab.
    x = jnp.pad(src.reshape(N, D).astype(jnp.float32), ((0, 0), (0, Dp - D)))

    # Combined additive mask: user mask on per-batch diagonal blocks, -1e30
    # elsewhere so rows of one batch never attend to keys of another batch.
    blk = jnp.kron(jnp.eye(B, dtype=jnp.float32), jnp.ones((L, L), jnp.float32))
    combined = jnp.where(blk > 0.5,
                         jnp.tile(mask.astype(jnp.float32), (B, B)),
                         jnp.float32(-1e30))

    packed = _pack_layer_params(layer_params, model_dim=D, num_heads=num_heads)

    vmem = pl.BlockSpec(memory_space=pltpu.MemorySpace.VMEM)
    kernel = functools.partial(_tst_encoder_kernel, n_layers=n_layers,
                               num_heads=num_heads, d_k=d_k, d_v=d_v, eps=eps)
    # Total VMEM footprint here is well under 1 MiB (activations + all stacked
    # weights), so a conservative 32 MiB limit fits v5e/v6e/v7x alike.
    out = pl.pallas_call(
        kernel,
        out_shape=jax.ShapeDtypeStruct((N, Dp), jnp.float32),
        in_specs=[vmem] * (2 + len(packed)),
        out_specs=vmem,
        compiler_params=pltpu.CompilerParams(vmem_limit_bytes=32 * 1024 * 1024),
    )(x, combined, *packed)
    return out[:, :D].reshape(B, L, D)


def init_layer_params(key, model_dim, num_heads, d_ff):
    d_k = model_dim // num_heads
    d_v = model_dim // num_heads
    ks = jax.random.split(key, 8)

    def lin(k, fan_in, shape):
        bound = 1.0 / math.sqrt(fan_in)
        return jax.random.uniform(k, shape, jnp.float32, -bound, bound)

    return dict(
        wq=lin(ks[0], model_dim, (model_dim, num_heads * d_k)),   # bias=False
        wk=lin(ks[1], model_dim, (model_dim, num_heads * d_k)),   # bias=False
        wv=lin(ks[2], model_dim, (model_dim, num_heads * d_v)),   # bias=False
        wo=lin(ks[3], num_heads * d_v, (num_heads * d_v, model_dim)),
        bo=lin(ks[4], num_heads * d_v, (1, model_dim)),
        bn1_gamma=jnp.ones((1, model_dim), jnp.float32),          # BatchNorm default init
        bn1_beta=jnp.zeros((1, model_dim), jnp.float32),
        ff_w1=lin(ks[5], model_dim, (model_dim, d_ff)),
        ff_b1=lin(ks[6], model_dim, (1, d_ff)),
        ff_w2=lin(ks[7], d_ff, (d_ff, model_dim)),
        ff_b2=jnp.zeros((1, model_dim), jnp.float32),
        bn2_gamma=jnp.ones((1, model_dim), jnp.float32),
        bn2_beta=jnp.zeros((1, model_dim), jnp.float32),
    )


if __name__ == "__main__":
    B, L, D, H, D_FF, N_LAYERS = 2, 8, 32, 4, 64, 2

    key = jax.random.PRNGKey(0)
    k_src, k_params = jax.random.split(key)
    src = jax.random.normal(k_src, (B, L, D), jnp.float32)
    # mask=None in the PyTorch call -> additive zero mask
    mask = jnp.zeros((L, L), jnp.float32)

    layer_keys = jax.random.split(k_params, N_LAYERS)
    params = [init_layer_params(k, D, H, D_FF) for k in layer_keys]

    out = tst_encoder(src, mask, params, num_heads=H)
    out = jax.block_until_ready(out)

    assert out.shape == (B, L, D)
    assert bool(jnp.isfinite(out).all())
    print("KERNEL_OK")
</pallas_src>

<mosaic_0001>
module attributes {stable_mosaic.version = 11 : i64} {
  func.func @_tst_encoder_kernel(%arg0: memref<16x128xf32, #tpu.memory_space<vmem>>, %arg1: memref<16x16xf32, #tpu.memory_space<vmem>>, %arg2: memref<2x128x128xbf16, #tpu.memory_space<vmem>>, %arg3: memref<2x32x128xbf16, #tpu.memory_space<vmem>>, %arg4: memref<2x1x128xf32, #tpu.memory_space<vmem>>, %arg5: memref<2x1x128xf32, #tpu.memory_space<vmem>>, %arg6: memref<2x1x128xf32, #tpu.memory_space<vmem>>, %arg7: memref<2x128x128xbf16, #tpu.memory_space<vmem>>, %arg8: memref<2x1x128xf32, #tpu.memory_space<vmem>>, %arg9: memref<2x128x128xbf16, #tpu.memory_space<vmem>>, %arg10: memref<2x1x128xf32, #tpu.memory_space<vmem>>, %arg11: memref<2x1x128xf32, #tpu.memory_space<vmem>>, %arg12: memref<2x1x128xf32, #tpu.memory_space<vmem>>, %arg13: memref<16x128xf32, #tpu.memory_space<vmem>>) attributes {dimension_semantics = [], scalar_prefetch = 0 : i64, scratch_operands = 0 : i64, tpu.core_type = #tpu.core_type<tc>} {
    %c0 = arith.constant 0 : index
    %c0_0 = arith.constant 0 : index
    %0 = vector.load %arg1[%c0, %c0_0] : memref<16x16xf32, #tpu.memory_space<vmem>>, vector<16x16xf32>
    %c0_1 = arith.constant 0 : index
    %c0_2 = arith.constant 0 : index
    %1 = vector.load %arg0[%c0_1, %c0_2] : memref<16x128xf32, #tpu.memory_space<vmem>>, vector<16x128xf32>
    %2 = arith.truncf %1 : vector<16x128xf32> to vector<16x128xbf16>
    %c0_3 = arith.constant 0 : index
    %c0_4 = arith.constant 0 : index
    %c0_5 = arith.constant 0 : index
    %3 = vector.load %arg2[%c0_3, %c0_4, %c0_5] : memref<2x128x128xbf16, #tpu.memory_space<vmem>>, vector<1x128x128xbf16>
    %4 = vector.shape_cast %3 : vector<1x128x128xbf16> to vector<128x128xbf16>
    %cst = arith.constant dense<0.000000e+00> : vector<16x128xf32>
    %5 = tpu.matmul %2, %4, %cst {dimension_numbers = #tpu.dot_dimension_numbers<[1], [0], [0], [1], [0, 0, 1, 1], [], []>} : vector<16x128xbf16>, vector<128x128xbf16>, vector<16x128xf32> -> vector<16x128xf32>
    %6 = arith.truncf %5 : vector<16x128xf32> to vector<16x128xbf16>
    %7 = vector.extract_strided_slice %6 {offsets = [0, 0], sizes = [16, 8], strides = [1, 1]} : vector<16x128xbf16> to vector<16x8xbf16>
    %8 = vector.extract_strided_slice %6 {offsets = [0, 32], sizes = [16, 8], strides = [1, 1]} : vector<16x128xbf16> to vector<16x8xbf16>
    %9 = vector.extract_strided_slice %6 {offsets = [0, 64], sizes = [16, 8], strides = [1, 1]} : vector<16x128xbf16> to vector<16x8xbf16>
    %cst_6 = arith.constant dense<0.000000e+00> : vector<16x16xf32>
    %10 = tpu.matmul %7, %8, %cst_6 {dimension_numbers = #tpu.dot_dimension_numbers<[1], [1], [0], [0], [0, 0, 1, 0], [], []>} : vector<16x8xbf16>, vector<16x8xbf16>, vector<16x16xf32> -> vector<16x16xf32>
    %cst_7 = arith.constant 0.353553385 : f32
    %11 = vector.broadcast %cst_7 : f32 to vector<16x16xf32>
    %12 = arith.mulf %10, %11 : vector<16x16xf32>
    %13 = arith.addf %12, %0 : vector<16x16xf32>
    %cst_8 = arith.constant dense<0xFF800000> : vector<16xf32>
    %14 = vector.multi_reduction <maximumf>, %13, %cst_8 [1] : vector<16x16xf32> to vector<16xf32>
    %15 = vector.shape_cast %14 : vector<16xf32> to vector<16x1xf32>
    %16 = vector.broadcast %15 : vector<16x1xf32> to vector<16x16xf32>
    %17 = arith.subf %13, %16 : vector<16x16xf32>
    %18 = math.exp %17 : vector<16x16xf32>
    %cst_9 = arith.constant dense<0.000000e+00> : vector<16xf32>
    %19 = vector.multi_reduction <add>, %18, %cst_9 [1] : vector<16x16xf32> to vector<16xf32>
    %20 = vector.shape_cast %19 : vector<16xf32> to vector<16x1xf32>
    %21 = tpu.reciprocal %20 {approx = true} : vector<16x1xf32> -> vector<16x1xf32>
    %22 = vector.broadcast %21 : vector<16x1xf32> to vector<16x16xf32>
    %23 = arith.mulf %18, %22 : vector<16x16xf32>
    %24 = arith.truncf %23 : vector<16x16xf32> to vector<16x16xbf16>
    %cst_10 = arith.constant dense<0.000000e+00> : vector<16x8xf32>
    %25 = tpu.matmul %24, %9, %cst_10 {dimension_numbers = #tpu.dot_dimension_numbers<[1], [0], [0], [1], [0, 0, 1, 1], [], []>} : vector<16x16xbf16>, vector<16x8xbf16>, vector<16x8xf32> -> vector<16x8xf32>
    %26 = vector.extract_strided_slice %6 {offsets = [0, 8], sizes = [16, 8], strides = [1, 1]} : vector<16x128xbf16> to vector<16x8xbf16>
    %27 = vector.extract_strided_slice %6 {offsets = [0, 40], sizes = [16, 8], strides = [1, 1]} : vector<16x128xbf16> to vector<16x8xbf16>
    %28 = vector.extract_strided_slice %6 {offsets = [0, 72], sizes = [16, 8], strides = [1, 1]} : vector<16x128xbf16> to vector<16x8xbf16>
    %cst_11 = arith.constant dense<0.000000e+00> : vector<16x16xf32>
    %29 = tpu.matmul %26, %27, %cst_11 {dimension_numbers = #tpu.dot_dimension_numbers<[1], [1], [0], [0], [0, 0, 1, 0], [], []>} : vector<16x8xbf16>, vector<16x8xbf16>, vector<16x16xf32> -> vector<16x16xf32>
    %cst_12 = arith.constant 0.353553385 : f32
    %30 = vector.broadcast %cst_12 : f32 to vector<16x16xf32>
    %31 = arith.mulf %29, %30 : vector<16x16xf32>
    %32 = arith.addf %31, %0 : vector<16x16xf32>
    %cst_13 = arith.constant dense<0xFF800000> : vector<16xf32>
    %33 = vector.multi_reduction <maximumf>, %32, %cst_13 [1] : vector<16x16xf32> to vector<16xf32>
    %34 = vector.shape_cast %33 : vector<16xf32> to vector<16x1xf32>
    %35 = vector.broadcast %34 : vector<16x1xf32> to vector<16x16xf32>
    %36 = arith.subf %32, %35 : vector<16x16xf32>
    %37 = math.exp %36 : vector<16x16xf32>
    %cst_14 = arith.constant dense<0.000000e+00> : vector<16xf32>
    %38 = vector.multi_reduction <add>, %37, %cst_14 [1] : vector<16x16xf32> to vector<16xf32>
    %39 = vector.shape_cast %38 : vector<16xf32> to vector<16x1xf32>
    %40 = tpu.reciprocal %39 {approx = true} : vector<16x1xf32> -> vector<16x1xf32>
    %41 = vector.broadcast %40 : vector<16x1xf32> to vector<16x16xf32>
    %42 = arith.mulf %37, %41 : vector<16x16xf32>
    %43 = arith.truncf %42 : vector<16x16xf32> to vector<16x16xbf16>
    %cst_15 = arith.constant dense<0.000000e+00> : vector<16x8xf32>
    %44 = tpu.matmul %43, %28, %cst_15 {dimension_numbers = #tpu.dot_dimension_numbers<[1], [0], [0], [1], [0, 0, 1, 1], [], []>} : vector<16x16xbf16>, vector<16x8xbf16>, vector<16x8xf32> -> vector<16x8xf32>
    %45 = vector.extract_strided_slice %6 {offsets = [0, 16], sizes = [16, 8], strides = [1, 1]} : vector<16x128xbf16> to vector<16x8xbf16>
    %46 = vector.extract_strided_slice %6 {offsets = [0, 48], sizes = [16, 8], strides = [1, 1]} : vector<16x128xbf16> to vector<16x8xbf16>
    %47 = vector.extract_strided_slice %6 {offsets = [0, 80], sizes = [16, 8], strides = [1, 1]} : vector<16x128xbf16> to vector<16x8xbf16>
    %cst_16 = arith.constant dense<0.000000e+00> : vector<16x16xf32>
    %48 = tpu.matmul %45, %46, %cst_16 {dimension_numbers = #tpu.dot_dimension_numbers<[1], [1], [0], [0], [0, 0, 1, 0], [], []>} : vector<16x8xbf16>, vector<16x8xbf16>, vector<16x16xf32> -> vector<16x16xf32>
    %cst_17 = arith.constant 0.353553385 : f32
    %49 = vector.broadcast %cst_17 : f32 to vector<16x16xf32>
    %50 = arith.mulf %48, %49 : vector<16x16xf32>
    %51 = arith.addf %50, %0 : vector<16x16xf32>
    %cst_18 = arith.constant dense<0xFF800000> : vector<16xf32>
    %52 = vector.multi_reduction <maximumf>, %51, %cst_18 [1] : vector<16x16xf32> to vector<16xf32>
    %53 = vector.shape_cast %52 : vector<16xf32> to vector<16x1xf32>
    %54 = vector.broadcast %53 : vector<16x1xf32> to vector<16x16xf32>
    %55 = arith.subf %51, %54 : vector<16x16xf32>
    %56 = math.exp %55 : vector<16x16xf32>
    %cst_19 = arith.constant dense<0.000000e+00> : vector<16xf32>
    %57 = vector.multi_reduction <add>, %56, %cst_19 [1] : vector<16x16xf32> to vector<16xf32>
    %58 = vector.shape_cast %57 : vector<16xf32> to vector<16x1xf32>
    %59 = tpu.reciprocal %58 {approx = true} : vector<16x1xf32> -> vector<16x1xf32>
    %60 = vector.broadcast %59 : vector<16x1xf32> to vector<16x16xf32>
    %61 = arith.mulf %56, %60 : vector<16x16xf32>
    %62 = arith.truncf %61 : vector<16x16xf32> to vector<16x16xbf16>
    %cst_20 = arith.constant dense<0.000000e+00> : vector<16x8xf32>
    %63 = tpu.matmul %62, %47, %cst_20 {dimension_numbers = #tpu.dot_dimension_numbers<[1], [0], [0], [1], [0, 0, 1, 1], [], []>} : vector<16x16xbf16>, vector<16x8xbf16>, vector<16x8xf32> -> vector<16x8xf32>
    %64 = vector.extract_strided_slice %6 {offsets = [0, 24], sizes = [16, 8], strides = [1, 1]} : vector<16x128xbf16> to vector<16x8xbf16>
    %65 = vector.extract_strided_slice %6 {offsets = [0, 56], sizes = [16, 8], strides = [1, 1]} : vector<16x128xbf16> to vector<16x8xbf16>
    %66 = vector.extract_strided_slice %6 {offsets = [0, 88], sizes = [16, 8], strides = [1, 1]} : vector<16x128xbf16> to vector<16x8xbf16>
    %cst_21 = arith.constant dense<0.000000e+00> : vector<16x16xf32>
    %67 = tpu.matmul %64, %65, %cst_21 {dimension_numbers = #tpu.dot_dimension_numbers<[1], [1], [0], [0], [0, 0, 1, 0], [], []>} : vector<16x8xbf16>, vector<16x8xbf16>, vector<16x16xf32> -> vector<16x16xf32>
    %cst_22 = arith.constant 0.353553385 : f32
    %68 = vector.broadcast %cst_22 : f32 to vector<16x16xf32>
    %69 = arith.mulf %67, %68 : vector<16x16xf32>
    %70 = arith.addf %69, %0 : vector<16x16xf32>
    %cst_23 = arith.constant dense<0xFF800000> : vector<16xf32>
    %71 = vector.multi_reduction <maximumf>, %70, %cst_23 [1] : vector<16x16xf32> to vector<16xf32>
    %72 = vector.shape_cast %71 : vector<16xf32> to vector<16x1xf32>
    %73 = vector.broadcast %72 : vector<16x1xf32> to vector<16x16xf32>
    %74 = arith.subf %70, %73 : vector<16x16xf32>
    %75 = math.exp %74 : vector<16x16xf32>
    %cst_24 = arith.constant dense<0.000000e+00> : vector<16xf32>
    %76 = vector.multi_reduction <add>, %75, %cst_24 [1] : vector<16x16xf32> to vector<16xf32>
    %77 = vector.shape_cast %76 : vector<16xf32> to vector<16x1xf32>
    %78 = tpu.reciprocal %77 {approx = true} : vector<16x1xf32> -> vector<16x1xf32>
    %79 = vector.broadcast %78 : vector<16x1xf32> to vector<16x16xf32>
    %80 = arith.mulf %75, %79 : vector<16x16xf32>
    %81 = arith.truncf %80 : vector<16x16xf32> to vector<16x16xbf16>
    %cst_25 = arith.constant dense<0.000000e+00> : vector<16x8xf32>
    %82 = tpu.matmul %81, %66, %cst_25 {dimension_numbers = #tpu.dot_dimension_numbers<[1], [0], [0], [1], [0, 0, 1, 1], [], []>} : vector<16x16xbf16>, vector<16x8xbf16>, vector<16x8xf32> -> vector<16x8xf32>
    %83 = tpu.concatenate %25, %44, %63, %82 in 1 : vector<16x8xf32>, vector<16x8xf32>, vector<16x8xf32>, vector<16x8xf32> -> vector<16x32xf32>
    %84 = arith.truncf %83 : vector<16x32xf32> to vector<16x32xbf16>
    %c0_26 = arith.constant 0 : index
    %c0_27 = arith.constant 0 : index
    %c0_28 = arith.constant 0 : index
    %85 = vector.load %arg3[%c0_26, %c0_27, %c0_28] : memref<2x32x128xbf16, #tpu.memory_space<vmem>>, vector<1x32x128xbf16>
    %86 = vector.shape_cast %85 : vector<1x32x128xbf16> to vector<32x128xbf16>
    %cst_29 = arith.constant dense<0.000000e+00> : vector<16x128xf32>
    %87 = tpu.matmul %84, %86, %cst_29 {dimension_numbers = #tpu.dot_dimension_numbers<[1], [0], [0], [1], [0, 0, 1, 1], [], []>} : vector<16x32xbf16>, vector<32x128xbf16>, vector<16x128xf32> -> vector<16x128xf32>
    %c0_30 = arith.constant 0 : index
    %c0_31 = arith.constant 0 : index
    %c0_32 = arith.constant 0 : index
    %88 = vector.load %arg4[%c0_30, %c0_31, %c0_32] : memref<2x1x128xf32, #tpu.memory_space<vmem>>, vector<1x1x128xf32>
    %89 = vector.shape_cast %88 : vector<1x1x128xf32> to vector<1x128xf32>
    %90 = vector.broadcast %89 : vector<1x128xf32> to vector<16x128xf32>
    %91 = arith.addf %87, %90 : vector<16x128xf32>
    %92 = arith.addf %1, %91 : vector<16x128xf32>
    %cst_33 = arith.constant dense<0.000000e+00> : vector<128xf32>
    %93 = vector.multi_reduction <add>, %92, %cst_33 [0] : vector<16x128xf32> to vector<128xf32>
    %94 = vector.shape_cast %93 : vector<128xf32> to vector<1x128xf32>
    %cst_34 = arith.constant 6.250000e-02 : f32
    %95 = vector.broadcast %cst_34 : f32 to vector<1x128xf32>
    %96 = arith.mulf %94, %95 : vector<1x128xf32>
    %97 = vector.broadcast %96 : vector<1x128xf32> to vector<16x128xf32>
    %98 = arith.subf %92, %97 : vector<16x128xf32>
    %99 = arith.mulf %98, %98 : vector<16x128xf32>
    %cst_35 = arith.constant dense<0.000000e+00> : vector<128xf32>
    %100 = vector.multi_reduction <add>, %99, %cst_35 [0] : vector<16x128xf32> to vector<128xf32>
    %101 = vector.shape_cast %100 : vector<128xf32> to vector<1x128xf32>
    %cst_36 = arith.constant 6.250000e-02 : f32
    %102 = vector.broadcast %cst_36 : f32 to vector<1x128xf32>
    %103 = arith.mulf %101, %102 : vector<1x128xf32>
    %cst_37 = arith.constant 9.99999974E-6 : f32
    %104 = vector.broadcast %cst_37 : f32 to vector<1x128xf32>
    %105 = arith.addf %103, %104 : vector<1x128xf32>
    %106 = math.rsqrt %105 : vector<1x128xf32>
    %c0_38 = arith.constant 0 : index
    %c0_39 = arith.constant 0 : index
    %c0_40 = arith.constant 0 : index
    %107 = vector.load %arg5[%c0_38, %c0_39, %c0_40] : memref<2x1x128xf32, #tpu.memory_space<vmem>>, vector<1x1x128xf32>
    %108 = vector.shape_cast %107 : vector<1x1x128xf32> to vector<1x128xf32>
    %109 = arith.mulf %106, %108 : vector<1x128xf32>
    %110 = vector.broadcast %109 : vector<1x128xf32> to vector<16x128xf32>
    %111 = arith.mulf %98, %110 : vector<16x128xf32>
    %c0_41 = arith.constant 0 : index
    %c0_42 = arith.constant 0 : index
    %c0_43 = arith.constant 0 : index
    %112 = vector.load %arg6[%c0_41, %c0_42, %c0_43] : memref<2x1x128xf32, #tpu.memory_space<vmem>>, vector<1x1x128xf32>
    %113 = vector.shape_cast %112 : vector<1x1x128xf32> to vector<1x128xf32>
    %114 = vector.broadcast %113 : vector<1x128xf32> to vector<16x128xf32>
    %115 = arith.addf %111, %114 : vector<16x128xf32>
    %116 = arith.truncf %115 : vector<16x128xf32> to vector<16x128xbf16>
    %c0_44 = arith.constant 0 : index
    %c0_45 = arith.constant 0 : index
    %c0_46 = arith.constant 0 : index
    %117 = vector.load %arg7[%c0_44, %c0_45, %c0_46] : memref<2x128x128xbf16, #tpu.memory_space<vmem>>, vector<1x128x128xbf16>
    %118 = vector.shape_cast %117 : vector<1x128x128xbf16> to vector<128x128xbf16>
    %cst_47 = arith.constant dense<0.000000e+00> : vector<16x128xf32>
    %119 = tpu.matmul %116, %118, %cst_47 {dimension_numbers = #tpu.dot_dimension_numbers<[1], [0], [0], [1], [0, 0, 1, 1], [], []>} : vector<16x128xbf16>, vector<128x128xbf16>, vector<16x128xf32> -> vector<16x128xf32>
    %c0_48 = arith.constant 0 : index
    %c0_49 = arith.constant 0 : index
    %c0_50 = arith.constant 0 : index
    %120 = vector.load %arg8[%c0_48, %c0_49, %c0_50] : memref<2x1x128xf32, #tpu.memory_space<vmem>>, vector<1x1x128xf32>
    %121 = vector.shape_cast %120 : vector<1x1x128xf32> to vector<1x128xf32>
    %122 = vector.broadcast %121 : vector<1x128xf32> to vector<16x128xf32>
    %123 = arith.addf %119, %122 : vector<16x128xf32>
    %cst_51 = arith.constant 5.000000e-01 : f32
    %124 = vector.broadcast %cst_51 : f32 to vector<16x128xf32>
    %125 = arith.mulf %124, %123 : vector<16x128xf32>
    %126 = arith.mulf %123, %123 : vector<16x128xf32>
    %127 = arith.mulf %126, %123 : vector<16x128xf32>
    %cst_52 = arith.constant 4.471500e-02 : f32
    %128 = vector.broadcast %cst_52 : f32 to vector<16x128xf32>
    %129 = arith.mulf %128, %127 : vector<16x128xf32>
    %130 = arith.addf %123, %129 : vector<16x128xf32>
    %cst_53 = arith.constant 0.797884583 : f32
    %131 = vector.broadcast %cst_53 : f32 to vector<16x128xf32>
    %132 = arith.mulf %131, %130 : vector<16x128xf32>
    %133 = math.tanh %132 : vector<16x128xf32>
    %cst_54 = arith.constant 1.000000e+00 : f32
    %134 = vector.broadcast %cst_54 : f32 to vector<16x128xf32>
    %135 = arith.addf %134, %133 : vector<16x128xf32>
    %136 = arith.mulf %125, %135 : vector<16x128xf32>
    %137 = arith.truncf %136 : vector<16x128xf32> to vector<16x128xbf16>
    %c0_55 = arith.constant 0 : index
    %c0_56 = arith.constant 0 : index
    %c0_57 = arith.constant 0 : index
    %138 = vector.load %arg9[%c0_55, %c0_56, %c0_57] : memref<2x128x128xbf16, #tpu.memory_space<vmem>>, vector<1x128x128xbf16>
    %139 = vector.shape_cast %138 : vector<1x128x128xbf16> to vector<128x128xbf16>
    %cst_58 = arith.constant dense<0.000000e+00> : vector<16x128xf32>
    %140 = tpu.matmul %137, %139, %cst_58 {dimension_numbers = #tpu.dot_dimension_numbers<[1], [0], [0], [1], [0, 0, 1, 1], [], []>} : vector<16x128xbf16>, vector<128x128xbf16>, vector<16x128xf32> -> vector<16x128xf32>
    %c0_59 = arith.constant 0 : index
    %c0_60 = arith.constant 0 : index
    %c0_61 = arith.constant 0 : index
    %141 = vector.load %arg10[%c0_59, %c0_60, %c0_61] : memref<2x1x128xf32, #tpu.memory_space<vmem>>, vector<1x1x128xf32>
    %142 = vector.shape_cast %141 : vector<1x1x128xf32> to vector<1x128xf32>
    %143 = vector.broadcast %142 : vector<1x128xf32> to vector<16x128xf32>
    %144 = arith.addf %140, %143 : vector<16x128xf32>
    %145 = arith.addf %115, %144 : vector<16x128xf32>
    %cst_62 = arith.constant dense<0.000000e+00> : vector<128xf32>
    %146 = vector.multi_reduction <add>, %145, %cst_62 [0] : vector<16x128xf32> to vector<128xf32>
    %147 = vector.shape_cast %146 : vector<128xf32> to vector<1x128xf32>
    %cst_63 = arith.constant 6.250000e-02 : f32
    %148 = vector.broadcast %cst_63 : f32 to vector<1x128xf32>
    %149 = arith.mulf %147, %148 : vector<1x128xf32>
    %150 = vector.broadcast %149 : vector<1x128xf32> to vector<16x128xf32>
    %151 = arith.subf %145, %150 : vector<16x128xf32>
    %152 = arith.mulf %151, %151 : vector<16x128xf32>
    %cst_64 = arith.constant dense<0.000000e+00> : vector<128xf32>
    %153 = vector.multi_reduction <add>, %152, %cst_64 [0] : vector<16x128xf32> to vector<128xf32>
    %154 = vector.shape_cast %153 : vector<128xf32> to vector<1x128xf32>
    %cst_65 = arith.constant 6.250000e-02 : f32
    %155 = vector.broadcast %cst_65 : f32 to vector<1x128xf32>
    %156 = arith.mulf %154, %155 : vector<1x128xf32>
    %cst_66 = arith.constant 9.99999974E-6 : f32
    %157 = vector.broadcast %cst_66 : f32 to vector<1x128xf32>
    %158 = arith.addf %156, %157 : vector<1x128xf32>
    %159 = math.rsqrt %158 : vector<1x128xf32>
    %c0_67 = arith.constant 0 : index
    %c0_68 = arith.constant 0 : index
    %c0_69 = arith.constant 0 : index
    %160 = vector.load %arg11[%c0_67, %c0_68, %c0_69] : memref<2x1x128xf32, #tpu.memory_space<vmem>>, vector<1x1x128xf32>
    %161 = vector.shape_cast %160 : vector<1x1x128xf32> to vector<1x128xf32>
    %162 = arith.mulf %159, %161 : vector<1x128xf32>
    %163 = vector.broadcast %162 : vector<1x128xf32> to vector<16x128xf32>
    %164 = arith.mulf %151, %163 : vector<16x128xf32>
    %c0_70 = arith.constant 0 : index
    %c0_71 = arith.constant 0 : index
    %c0_72 = arith.constant 0 : index
    %165 = vector.load %arg12[%c0_70, %c0_71, %c0_72] : memref<2x1x128xf32, #tpu.memory_space<vmem>>, vector<1x1x128xf32>
    %166 = vector.shape_cast %165 : vector<1x1x128xf32> to vector<1x128xf32>
    %167 = vector.broadcast %166 : vector<1x128xf32> to vector<16x128xf32>
    %168 = arith.addf %164, %167 : vector<16x128xf32>
    %169 = arith.truncf %168 : vector<16x128xf32> to vector<16x128xbf16>
    %c1 = arith.constant 1 : index
    %c0_73 = arith.constant 0 : index
    %c0_74 = arith.constant 0 : index
    %170 = vector.load %arg2[%c1, %c0_73, %c0_74] : memref<2x128x128xbf16, #tpu.memory_space<vmem>>, vector<1x128x128xbf16>
    %171 = vector.shape_cast %170 : vector<1x128x128xbf16> to vector<128x128xbf16>
    %cst_75 = arith.constant dense<0.000000e+00> : vector<16x128xf32>
    %172 = tpu.matmul %169, %171, %cst_75 {dimension_numbers = #tpu.dot_dimension_numbers<[1], [0], [0], [1], [0, 0, 1, 1], [], []>} : vector<16x128xbf16>, vector<128x128xbf16>, vector<16x128xf32> -> vector<16x128xf32>
    %173 = arith.truncf %172 : vector<16x128xf32> to vector<16x128xbf16>
    %174 = vector.extract_strided_slice %173 {offsets = [0, 0], sizes = [16, 8], strides = [1, 1]} : vector<16x128xbf16> to vector<16x8xbf16>
    %175 = vector.extract_strided_slice %173 {offsets = [0, 32], sizes = [16, 8], strides = [1, 1]} : vector<16x128xbf16> to vector<16x8xbf16>
    %176 = vector.extract_strided_slice %173 {offsets = [0, 64], sizes = [16, 8], strides = [1, 1]} : vector<16x128xbf16> to vector<16x8xbf16>
    %cst_76 = arith.constant dense<0.000000e+00> : vector<16x16xf32>
    %177 = tpu.matmul %174, %175, %cst_76 {dimension_numbers = #tpu.dot_dimension_numbers<[1], [1], [0], [0], [0, 0, 1, 0], [], []>} : vector<16x8xbf16>, vector<16x8xbf16>, vector<16x16xf32> -> vector<16x16xf32>
    %cst_77 = arith.constant 0.353553385 : f32
    %178 = vector.broadcast %cst_77 : f32 to vector<16x16xf32>
    %179 = arith.mulf %177, %178 : vector<16x16xf32>
    %180 = arith.addf %179, %0 : vector<16x16xf32>
    %cst_78 = arith.constant dense<0xFF800000> : vector<16xf32>
    %181 = vector.multi_reduction <maximumf>, %180, %cst_78 [1] : vector<16x16xf32> to vector<16xf32>
    %182 = vector.shape_cast %181 : vector<16xf32> to vector<16x1xf32>
    %183 = vector.broadcast %182 : vector<16x1xf32> to vector<16x16xf32>
    %184 = arith.subf %180, %183 : vector<16x16xf32>
    %185 = math.exp %184 : vector<16x16xf32>
    %cst_79 = arith.constant dense<0.000000e+00> : vector<16xf32>
    %186 = vector.multi_reduction <add>, %185, %cst_79 [1] : vector<16x16xf32> to vector<16xf32>
    %187 = vector.shape_cast %186 : vector<16xf32> to vector<16x1xf32>
    %188 = tpu.reciprocal %187 {approx = true} : vector<16x1xf32> -> vector<16x1xf32>
    %189 = vector.broadcast %188 : vector<16x1xf32> to vector<16x16xf32>
    %190 = arith.mulf %185, %189 : vector<16x16xf32>
    %191 = arith.truncf %190 : vector<16x16xf32> to vector<16x16xbf16>
    %cst_80 = arith.constant dense<0.000000e+00> : vector<16x8xf32>
    %192 = tpu.matmul %191, %176, %cst_80 {dimension_numbers = #tpu.dot_dimension_numbers<[1], [0], [0], [1], [0, 0, 1, 1], [], []>} : vector<16x16xbf16>, vector<16x8xbf16>, vector<16x8xf32> -> vector<16x8xf32>
    %193 = vector.extract_strided_slice %173 {offsets = [0, 8], sizes = [16, 8], strides = [1, 1]} : vector<16x128xbf16> to vector<16x8xbf16>
    %194 = vector.extract_strided_slice %173 {offsets = [0, 40], sizes = [16, 8], strides = [1, 1]} : vector<16x128xbf16> to vector<16x8xbf16>
    %195 = vector.extract_strided_slice %173 {offsets = [0, 72], sizes = [16, 8], strides = [1, 1]} : vector<16x128xbf16> to vector<16x8xbf16>
    %cst_81 = arith.constant dense<0.000000e+00> : vector<16x16xf32>
    %196 = tpu.matmul %193, %194, %cst_81 {dimension_numbers = #tpu.dot_dimension_numbers<[1], [1], [0], [0], [0, 0, 1, 0], [], []>} : vector<16x8xbf16>, vector<16x8xbf16>, vector<16x16xf32> -> vector<16x16xf32>
    %cst_82 = arith.constant 0.353553385 : f32
    %197 = vector.broadcast %cst_82 : f32 to vector<16x16xf32>
    %198 = arith.mulf %196, %197 : vector<16x16xf32>
    %199 = arith.addf %198, %0 : vector<16x16xf32>
    %cst_83 = arith.constant dense<0xFF800000> : vector<16xf32>
    %200 = vector.multi_reduction <maximumf>, %199, %cst_83 [1] : vector<16x16xf32> to vector<16xf32>
    %201 = vector.shape_cast %200 : vector<16xf32> to vector<16x1xf32>
    %202 = vector.broadcast %201 : vector<16x1xf32> to vector<16x16xf32>
    %203 = arith.subf %199, %202 : vector<16x16xf32>
    %204 = math.exp %203 : vector<16x16xf32>
    %cst_84 = arith.constant dense<0.000000e+00> : vector<16xf32>
    %205 = vector.multi_reduction <add>, %204, %cst_84 [1] : vector<16x16xf32> to vector<16xf32>
    %206 = vector.shape_cast %205 : vector<16xf32> to vector<16x1xf32>
    %207 = tpu.reciprocal %206 {approx = true} : vector<16x1xf32> -> vector<16x1xf32>
    %208 = vector.broadcast %207 : vector<16x1xf32> to vector<16x16xf32>
    %209 = arith.mulf %204, %208 : vector<16x16xf32>
    %210 = arith.truncf %209 : vector<16x16xf32> to vector<16x16xbf16>
    %cst_85 = arith.constant dense<0.000000e+00> : vector<16x8xf32>
    %211 = tpu.matmul %210, %195, %cst_85 {dimension_numbers = #tpu.dot_dimension_numbers<[1], [0], [0], [1], [0, 0, 1, 1], [], []>} : vector<16x16xbf16>, vector<16x8xbf16>, vector<16x8xf32> -> vector<16x8xf32>
    %212 = vector.extract_strided_slice %173 {offsets = [0, 16], sizes = [16, 8], strides = [1, 1]} : vector<16x128xbf16> to vector<16x8xbf16>
    %213 = vector.extract_strided_slice %173 {offsets = [0, 48], sizes = [16, 8], strides = [1, 1]} : vector<16x128xbf16> to vector<16x8xbf16>
    %214 = vector.extract_strided_slice %173 {offsets = [0, 80], sizes = [16, 8], strides = [1, 1]} : vector<16x128xbf16> to vector<16x8xbf16>
    %cst_86 = arith.constant dense<0.000000e+00> : vector<16x16xf32>
    %215 = tpu.matmul %212, %213, %cst_86 {dimension_numbers = #tpu.dot_dimension_numbers<[1], [1], [0], [0], [0, 0, 1, 0], [], []>} : vector<16x8xbf16>, vector<16x8xbf16>, vector<16x16xf32> -> vector<16x16xf32>
    %cst_87 = arith.constant 0.353553385 : f32
    %216 = vector.broadcast %cst_87 : f32 to vector<16x16xf32>
    %217 = arith.mulf %215, %216 : vector<16x16xf32>
    %218 = arith.addf %217, %0 : vector<16x16xf32>
    %cst_88 = arith.constant dense<0xFF800000> : vector<16xf32>
    %219 = vector.multi_reduction <maximumf>, %218, %cst_88 [1] : vector<16x16xf32> to vector<16xf32>
    %220 = vector.shape_cast %219 : vector<16xf32> to vector<16x1xf32>
    %221 = vector.broadcast %220 : vector<16x1xf32> to vector<16x16xf32>
    %222 = arith.subf %218, %221 : vector<16x16xf32>
    %223 = math.exp %222 : vector<16x16xf32>
    %cst_89 = arith.constant dense<0.000000e+00> : vector<16xf32>
    %224 = vector.multi_reduction <add>, %223, %cst_89 [1] : vector<16x16xf32> to vector<16xf32>
    %225 = vector.shape_cast %224 : vector<16xf32> to vector<16x1xf32>
    %226 = tpu.reciprocal %225 {approx = true} : vector<16x1xf32> -> vector<16x1xf32>
    %227 = vector.broadcast %226 : vector<16x1xf32> to vector<16x16xf32>
    %228 = arith.mulf %223, %227 : vector<16x16xf32>
    %229 = arith.truncf %228 : vector<16x16xf32> to vector<16x16xbf16>
    %cst_90 = arith.constant dense<0.000000e+00> : vector<16x8xf32>
    %230 = tpu.matmul %229, %214, %cst_90 {dimension_numbers = #tpu.dot_dimension_numbers<[1], [0], [0], [1], [0, 0, 1, 1], [], []>} : vector<16x16xbf16>, vector<16x8xbf16>, vector<16x8xf32> -> vector<16x8xf32>
    %231 = vector.extract_strided_slice %173 {offsets = [0, 24], sizes = [16, 8], strides = [1, 1]} : vector<16x128xbf16> to vector<16x8xbf16>
    %232 = vector.extract_strided_slice %173 {offsets = [0, 56], sizes = [16, 8], strides = [1, 1]} : vector<16x128xbf16> to vector<16x8xbf16>
    %233 = vector.extract_strided_slice %173 {offsets = [0, 88], sizes = [16, 8], strides = [1, 1]} : vector<16x128xbf16> to vector<16x8xbf16>
    %cst_91 = arith.constant dense<0.000000e+00> : vector<16x16xf32>
    %234 = tpu.matmul %231, %232, %cst_91 {dimension_numbers = #tpu.dot_dimension_numbers<[1], [1], [0], [0], [0, 0, 1, 0], [], []>} : vector<16x8xbf16>, vector<16x8xbf16>, vector<16x16xf32> -> vector<16x16xf32>
    %cst_92 = arith.constant 0.353553385 : f32
    %235 = vector.broadcast %cst_92 : f32 to vector<16x16xf32>
    %236 = arith.mulf %234, %235 : vector<16x16xf32>
    %237 = arith.addf %236, %0 : vector<16x16xf32>
    %cst_93 = arith.constant dense<0xFF800000> : vector<16xf32>
    %238 = vector.multi_reduction <maximumf>, %237, %cst_93 [1] : vector<16x16xf32> to vector<16xf32>
    %239 = vector.shape_cast %238 : vector<16xf32> to vector<16x1xf32>
    %240 = vector.broadcast %239 : vector<16x1xf32> to vector<16x16xf32>
    %241 = arith.subf %237, %240 : vector<16x16xf32>
    %242 = math.exp %241 : vector<16x16xf32>
    %cst_94 = arith.constant dense<0.000000e+00> : vector<16xf32>
    %243 = vector.multi_reduction <add>, %242, %cst_94 [1] : vector<16x16xf32> to vector<16xf32>
    %244 = vector.shape_cast %243 : vector<16xf32> to vector<16x1xf32>
    %245 = tpu.reciprocal %244 {approx = true} : vector<16x1xf32> -> vector<16x1xf32>
    %246 = vector.broadcast %245 : vector<16x1xf32> to vector<16x16xf32>
    %247 = arith.mulf %242, %246 : vector<16x16xf32>
    %248 = arith.truncf %247 : vector<16x16xf32> to vector<16x16xbf16>
    %cst_95 = arith.constant dense<0.000000e+00> : vector<16x8xf32>
    %249 = tpu.matmul %248, %233, %cst_95 {dimension_numbers = #tpu.dot_dimension_numbers<[1], [0], [0], [1], [0, 0, 1, 1], [], []>} : vector<16x16xbf16>, vector<16x8xbf16>, vector<16x8xf32> -> vector<16x8xf32>
    %250 = tpu.concatenate %192, %211, %230, %249 in 1 : vector<16x8xf32>, vector<16x8xf32>, vector<16x8xf32>, vector<16x8xf32> -> vector<16x32xf32>
    %251 = arith.truncf %250 : vector<16x32xf32> to vector<16x32xbf16>
    %c1_96 = arith.constant 1 : index
    %c0_97 = arith.constant 0 : index
    %c0_98 = arith.constant 0 : index
    %252 = vector.load %arg3[%c1_96, %c0_97, %c0_98] : memref<2x32x128xbf16, #tpu.memory_space<vmem>>, vector<1x32x128xbf16>
    %253 = vector.shape_cast %252 : vector<1x32x128xbf16> to vector<32x128xbf16>
    %cst_99 = arith.constant dense<0.000000e+00> : vector<16x128xf32>
    %254 = tpu.matmul %251, %253, %cst_99 {dimension_numbers = #tpu.dot_dimension_numbers<[1], [0], [0], [1], [0, 0, 1, 1], [], []>} : vector<16x32xbf16>, vector<32x128xbf16>, vector<16x128xf32> -> vector<16x128xf32>
    %c1_100 = arith.constant 1 : index
    %c0_101 = arith.constant 0 : index
    %c0_102 = arith.constant 0 : index
    %255 = vector.load %arg4[%c1_100, %c0_101, %c0_102] : memref<2x1x128xf32, #tpu.memory_space<vmem>>, vector<1x1x128xf32>
    %256 = vector.shape_cast %255 : vector<1x1x128xf32> to vector<1x128xf32>
    %257 = vector.broadcast %256 : vector<1x128xf32> to vector<16x128xf32>
    %258 = arith.addf %254, %257 : vector<16x128xf32>
    %259 = arith.addf %168, %258 : vector<16x128xf32>
    %cst_103 = arith.constant dense<0.000000e+00> : vector<128xf32>
    %260 = vector.multi_reduction <add>, %259, %cst_103 [0] : vector<16x128xf32> to vector<128xf32>
    %261 = vector.shape_cast %260 : vector<128xf32> to vector<1x128xf32>
    %cst_104 = arith.constant 6.250000e-02 : f32
    %262 = vector.broadcast %cst_104 : f32 to vector<1x128xf32>
    %263 = arith.mulf %261, %262 : vector<1x128xf32>
    %264 = vector.broadcast %263 : vector<1x128xf32> to vector<16x128xf32>
    %265 = arith.subf %259, %264 : vector<16x128xf32>
    %266 = arith.mulf %265, %265 : vector<16x128xf32>
    %cst_105 = arith.constant dense<0.000000e+00> : vector<128xf32>
    %267 = vector.multi_reduction <add>, %266, %cst_105 [0] : vector<16x128xf32> to vector<128xf32>
    %268 = vector.shape_cast %267 : vector<128xf32> to vector<1x128xf32>
    %cst_106 = arith.constant 6.250000e-02 : f32
    %269 = vector.broadcast %cst_106 : f32 to vector<1x128xf32>
    %270 = arith.mulf %268, %269 : vector<1x128xf32>
    %cst_107 = arith.constant 9.99999974E-6 : f32
    %271 = vector.broadcast %cst_107 : f32 to vector<1x128xf32>
    %272 = arith.addf %270, %271 : vector<1x128xf32>
    %273 = math.rsqrt %272 : vector<1x128xf32>
    %c1_108 = arith.constant 1 : index
    %c0_109 = arith.constant 0 : index
    %c0_110 = arith.constant 0 : index
    %274 = vector.load %arg5[%c1_108, %c0_109, %c0_110] : memref<2x1x128xf32, #tpu.memory_space<vmem>>, vector<1x1x128xf32>
    %275 = vector.shape_cast %274 : vector<1x1x128xf32> to vector<1x128xf32>
    %276 = arith.mulf %273, %275 : vector<1x128xf32>
    %277 = vector.broadcast %276 : vector<1x128xf32> to vector<16x128xf32>
    %278 = arith.mulf %265, %277 : vector<16x128xf32>
    %c1_111 = arith.constant 1 : index
    %c0_112 = arith.constant 0 : index
    %c0_113 = arith.constant 0 : index
    %279 = vector.load %arg6[%c1_111, %c0_112, %c0_113] : memref<2x1x128xf32, #tpu.memory_space<vmem>>, vector<1x1x128xf32>
    %280 = vector.shape_cast %279 : vector<1x1x128xf32> to vector<1x128xf32>
    %281 = vector.broadcast %280 : vector<1x128xf32> to vector<16x128xf32>
    %282 = arith.addf %278, %281 : vector<16x128xf32>
    %283 = arith.truncf %282 : vector<16x128xf32> to vector<16x128xbf16>
    %c1_114 = arith.constant 1 : index
    %c0_115 = arith.constant 0 : index
    %c0_116 = arith.constant 0 : index
    %284 = vector.load %arg7[%c1_114, %c0_115, %c0_116] : memref<2x128x128xbf16, #tpu.memory_space<vmem>>, vector<1x128x128xbf16>
    %285 = vector.shape_cast %284 : vector<1x128x128xbf16> to vector<128x128xbf16>
    %cst_117 = arith.constant dense<0.000000e+00> : vector<16x128xf32>
    %286 = tpu.matmul %283, %285, %cst_117 {dimension_numbers = #tpu.dot_dimension_numbers<[1], [0], [0], [1], [0, 0, 1, 1], [], []>} : vector<16x128xbf16>, vector<128x128xbf16>, vector<16x128xf32> -> vector<16x128xf32>
    %c1_118 = arith.constant 1 : index
    %c0_119 = arith.constant 0 : index
    %c0_120 = arith.constant 0 : index
    %287 = vector.load %arg8[%c1_118, %c0_119, %c0_120] : memref<2x1x128xf32, #tpu.memory_space<vmem>>, vector<1x1x128xf32>
    %288 = vector.shape_cast %287 : vector<1x1x128xf32> to vector<1x128xf32>
    %289 = vector.broadcast %288 : vector<1x128xf32> to vector<16x128xf32>
    %290 = arith.addf %286, %289 : vector<16x128xf32>
    %cst_121 = arith.constant 5.000000e-01 : f32
    %291 = vector.broadcast %cst_121 : f32 to vector<16x128xf32>
    %292 = arith.mulf %291, %290 : vector<16x128xf32>
    %293 = arith.mulf %290, %290 : vector<16x128xf32>
    %294 = arith.mulf %293, %290 : vector<16x128xf32>
    %cst_122 = arith.constant 4.471500e-02 : f32
    %295 = vector.broadcast %cst_122 : f32 to vector<16x128xf32>
    %296 = arith.mulf %295, %294 : vector<16x128xf32>
    %297 = arith.addf %290, %296 : vector<16x128xf32>
    %cst_123 = arith.constant 0.797884583 : f32
    %298 = vector.broadcast %cst_123 : f32 to vector<16x128xf32>
    %299 = arith.mulf %298, %297 : vector<16x128xf32>
    %300 = math.tanh %299 : vector<16x128xf32>
    %cst_124 = arith.constant 1.000000e+00 : f32
    %301 = vector.broadcast %cst_124 : f32 to vector<16x128xf32>
    %302 = arith.addf %301, %300 : vector<16x128xf32>
    %303 = arith.mulf %292, %302 : vector<16x128xf32>
    %304 = arith.truncf %303 : vector<16x128xf32> to vector<16x128xbf16>
    %c1_125 = arith.constant 1 : index
    %c0_126 = arith.constant 0 : index
    %c0_127 = arith.constant 0 : index
    %305 = vector.load %arg9[%c1_125, %c0_126, %c0_127] : memref<2x128x128xbf16, #tpu.memory_space<vmem>>, vector<1x128x128xbf16>
    %306 = vector.shape_cast %305 : vector<1x128x128xbf16> to vector<128x128xbf16>
    %cst_128 = arith.constant dense<0.000000e+00> : vector<16x128xf32>
    %307 = tpu.matmul %304, %306, %cst_128 {dimension_numbers = #tpu.dot_dimension_numbers<[1], [0], [0], [1], [0, 0, 1, 1], [], []>} : vector<16x128xbf16>, vector<128x128xbf16>, vector<16x128xf32> -> vector<16x128xf32>
    %c1_129 = arith.constant 1 : index
    %c0_130 = arith.constant 0 : index
    %c0_131 = arith.constant 0 : index
    %308 = vector.load %arg10[%c1_129, %c0_130, %c0_131] : memref<2x1x128xf32, #tpu.memory_space<vmem>>, vector<1x1x128xf32>
    %309 = vector.shape_cast %308 : vector<1x1x128xf32> to vector<1x128xf32>
    %310 = vector.broadcast %309 : vector<1x128xf32> to vector<16x128xf32>
    %311 = arith.addf %307, %310 : vector<16x128xf32>
    %312 = arith.addf %282, %311 : vector<16x128xf32>
    %cst_132 = arith.constant dense<0.000000e+00> : vector<128xf32>
    %313 = vector.multi_reduction <add>, %312, %cst_132 [0] : vector<16x128xf32> to vector<128xf32>
    %314 = vector.shape_cast %313 : vector<128xf32> to vector<1x128xf32>
    %cst_133 = arith.constant 6.250000e-02 : f32
    %315 = vector.broadcast %cst_133 : f32 to vector<1x128xf32>
    %316 = arith.mulf %314, %315 : vector<1x128xf32>
    %317 = vector.broadcast %316 : vector<1x128xf32> to vector<16x128xf32>
    %318 = arith.subf %312, %317 : vector<16x128xf32>
    %319 = arith.mulf %318, %318 : vector<16x128xf32>
    %cst_134 = arith.constant dense<0.000000e+00> : vector<128xf32>
    %320 = vector.multi_reduction <add>, %319, %cst_134 [0] : vector<16x128xf32> to vector<128xf32>
    %321 = vector.shape_cast %320 : vector<128xf32> to vector<1x128xf32>
    %cst_135 = arith.constant 6.250000e-02 : f32
    %322 = vector.broadcast %cst_135 : f32 to vector<1x128xf32>
    %323 = arith.mulf %321, %322 : vector<1x128xf32>
    %cst_136 = arith.constant 9.99999974E-6 : f32
    %324 = vector.broadcast %cst_136 : f32 to vector<1x128xf32>
    %325 = arith.addf %323, %324 : vector<1x128xf32>
    %326 = math.rsqrt %325 : vector<1x128xf32>
    %c1_137 = arith.constant 1 : index
    %c0_138 = arith.constant 0 : index
    %c0_139 = arith.constant 0 : index
    %327 = vector.load %arg11[%c1_137, %c0_138, %c0_139] : memref<2x1x128xf32, #tpu.memory_space<vmem>>, vector<1x1x128xf32>
    %328 = vector.shape_cast %327 : vector<1x1x128xf32> to vector<1x128xf32>
    %329 = arith.mulf %326, %328 : vector<1x128xf32>
    %330 = vector.broadcast %329 : vector<1x128xf32> to vector<16x128xf32>
    %331 = arith.mulf %318, %330 : vector<16x128xf32>
    %c1_140 = arith.constant 1 : index
    %c0_141 = arith.constant 0 : index
    %c0_142 = arith.constant 0 : index
    %332 = vector.load %arg12[%c1_140, %c0_141, %c0_142] : memref<2x1x128xf32, #tpu.memory_space<vmem>>, vector<1x1x128xf32>
    %333 = vector.shape_cast %332 : vector<1x1x128xf32> to vector<1x128xf32>
    %334 = vector.broadcast %333 : vector<1x128xf32> to vector<16x128xf32>
    %335 = arith.addf %331, %334 : vector<16x128xf32>
    %c0_143 = arith.constant 0 : index
    %c0_144 = arith.constant 0 : index
    %336 = vector.load %arg13[%c0_143, %c0_144] : memref<16x128xf32, #tpu.memory_space<vmem>>, vector<16x128xf32>
    tpu.vector_store %arg13[%c0_143, %c0_144], %335 {strides = array<i32>} : memref<16x128xf32, #tpu.memory_space<vmem>>, vector<16x128xf32>,
    return
  }
}

</mosaic_0001>

<bundles_post_ra>
// kernel: tpu_custom_call.1
= control target key start
LH: loop header
LB: loop body
LE: loop exit
PB: predicated region body
PF: predicated region fallthrough
CT: control target
= control target key end

     0   :  { %18 = vsyncpa [#allocation3], 0  ;;  %s2638_s0 = inlined_call_operand.hbm [shape: f32[16,128], index: 0, kind: input, shape index: {}]   ;;  %s2639_s1 = inlined_call_operand.hbm [shape: f32[16,16], index: 1, kind: input, shape index: {}]   ;;  %s2640_s2 = inlined_call_operand.hbm [shape: bf16[2,128,128], index: 2, kind: input, shape index: {}]   ;;  %s2641_s3 = inlined_call_operand.hbm [shape: bf16[2,32,128], index: 3, kind: input, shape index: {}]   ;;  %s2642_s4 = inlined_call_operand.vmem [shape: f32[2,1,128], index: 4, kind: input, shape index: {}]   ;;  %s2643_s5 = inlined_call_operand.vmem [shape: f32[2,1,128], index: 5, kind: input, shape index: {}]   ;;  %s2644_s6 = inlined_call_operand.hbm [shape: f32[2,1,128], index: 6, kind: input, shape index: {}]   ;;  %s2645_s7 = inlined_call_operand.hbm [shape: bf16[2,128,128], index: 7, kind: input, shape index: {}]   ;;  %s2646_s8 = inlined_call_operand.vmem [shape: f32[2,1,128], index: 8, kind: input, shape index: {}]   ;;  %s2647_s9 = inlined_call_operand.hbm [shape: bf16[2,128,128], index: 9, kind: input, shape index: {}]   ;;  %s2648_s10 = inlined_call_operand.vmem [shape: f32[2,1,128], index: 10, kind: input, shape index: {}]   ;;  %s2649_s11 = inlined_call_operand.vmem [shape: f32[2,1,128], index: 11, kind: input, shape index: {}]   ;;  %s2650_s12 = inlined_call_operand.hbm [shape: f32[2,1,128], index: 12, kind: input, shape index: {}]   ;;  %s2651_s13 = inlined_call_operand.hbm [shape: f32[16,128], index: 13, kind: output, shape index: {}]  }
   0x1   :  { %19 = vsyncpa [#allocation6], 0 }
   0x2   :  { %20 = vsyncpa [#allocation9], 0 }
   0x3   :  { %21 = vsyncpa [#allocation12], 0 }
   0x4   :  { %22 = vsyncpa [#allocation15], 0 }
   0x5   :  { %23 = vsyncpa [#allocation4], 0  ;;  %s41_s27 = sshll.u32 %s2639_s1, 4  ;;  %s2288_s28 = smov [#allocation5]   ;;  %s42_s27 = int_to_ptr.hbm [resolvable:$true] %s41_s27 }
   0x6   :  { %s43_s29 = sshll.u32 %s2288_s28, 4  ;;  %s2289_s30 = smov 128   ;;  %s44_s29 = int_to_ptr.vmem [resolvable:$true] %s43_s29 }
   0x7   :  { %s2290_s14 = smov 8   ;;  %s67_s17 = sshll.u32 %s2641_s3, 4  ;;  %s68_s17 = int_to_ptr.hbm [resolvable:$true] %s67_s17 }
   0x8   :  { %49 = dma.hbm_to_vmem [thread:$0]  %s42_s27, 256, %s44_s29, [#allocation6], %s2289_s30, %s2289_s30, %s2290_s14  }
   0x9   :  { %s2291_s18 = smov [#allocation8]   ;;  %s97_s1 = sshll.u32 %s2645_s7, 4  ;;  %s98_s1 = int_to_ptr.hbm [resolvable:$true] %s97_s1 }
   0xa   :  { %s69_s19 = sshll.u32 %s2291_s18, 4  ;;  %s2292_s22 = smov 64   ;;  %s70_s19 = int_to_ptr.vmem [resolvable:$true] %s69_s19 }
   0xb   :  { %s2293_s23 = smov 4   ;;  %s28_s26 = sshll.u32 %s2638_s0, 4  ;;  %s29_s26 = int_to_ptr.hbm [resolvable:$true] %s28_s26 }
   0xc   :  { %75 = dma.hbm_to_vmem [thread:$0]  %s68_s17, 512, %s70_s19, [#allocation9], %s2292_s22, %s2292_s22, %s2293_s23  }
   0xd   :  { %s2294_s3 = smov [#allocation11]   ;;  %s2295_s7 = smov [#allocation2]  }
   0xe   :  { %s99_s27 = sshll.u32 %s2294_s3, 4  ;;  %s30_s28 = sshll.u32 %s2295_s7, 4  ;;  %s100_s27 = int_to_ptr.vmem [resolvable:$true] %s99_s27  ;;  %s31_s28 = int_to_ptr.vmem [resolvable:$true] %s30_s28 }
   0xf   :  { %105 = dma.hbm_to_vmem [thread:$0]  %s98_s1, 2048, %s100_s27, [#allocation12], %s2292_s22, %s2292_s22, %s2293_s23  }
  0x10   :  { %s54_s16 = sshll.u32 %s2640_s2, 4  ;;  %s84_s18 = sshll.u32 %s2644_s6, 4  ;;  %s55_s16 = int_to_ptr.hbm [resolvable:$true] %s54_s16  ;;  %s85_s18 = int_to_ptr.hbm [resolvable:$true] %s84_s18 }
  0x11   :  { %36 = dma.hbm_to_vmem [thread:$0]  %s29_s26, 256, %s31_s28, [#allocation3], %s2289_s30, %s2289_s30, %s2290_s14  }
  0x12   :  { %s2296_s19 = smov [#allocation7]   ;;  %s2297_s21 = smov [#allocation10]  }
  0x13   :  { %s56_s20 = sshll.u32 %s2296_s19, 4  ;;  %s86_s2 = sshll.u32 %s2297_s21, 4  ;;  %s57_s20 = int_to_ptr.vmem [resolvable:$true] %s56_s20  ;;  %s87_s2 = int_to_ptr.vmem [resolvable:$true] %s86_s2 }
  0x14   :  { %62 = dma.hbm_to_vmem [thread:$0]  %s55_s16, 2048, %s57_s20, [#allocation6], %s2292_s22, %s2292_s22, %s2293_s23  }
  0x15   :  { %s2298_s1 = smov 16   ;;  %s2299_s24 = smov 1  }
  0x16   :  { %92 = dma.hbm_to_vmem [thread:$0]  %s85_s18, 32, %s87_s2, [#allocation9], %s2298_s1, %s2298_s1, %s2299_s24  }
  0x17   :  { %s112_s6 = sshll.u32 %s2647_s9, 4  ;;  %s2300_s3 = smov [#allocation13]   ;;  %s113_s6 = int_to_ptr.hbm [resolvable:$true] %s112_s6 }
  0x18   :  { %s114_s27 = sshll.u32 %s2300_s3, 4  ;;  %s129_s29 = sshll.u32 %s2650_s12, 4  ;;  %s115_s27 = int_to_ptr.vmem [resolvable:$true] %s114_s27  ;;  %s130_s29 = int_to_ptr.hbm [resolvable:$true] %s129_s29 }
  0x19   :  { %120 = dma.hbm_to_vmem [thread:$0]  %s113_s6, 2048, %s115_s27, [#allocation12], %s2292_s22, %s2292_s22, %s2293_s23  }
  0x1a   :  { %s2301_s15 = smov [#allocation14]  }
  0x1b   :  { %s131_s16 = sshll.u32 %s2301_s15, 4  ;;  %s132_s16 = int_to_ptr.vmem [resolvable:$true] %s131_s16 }
  0x1c   :  { %137 = dma.hbm_to_vmem [thread:$0]  %s130_s29, 32, %s132_s16, [#allocation15], %s2298_s1, %s2298_s1, %s2299_s24  }
  0x1d   :  { %2276 = dma.done.wait [#allocation3], 256  }
  0x1e   :  { %2277 = vsyncadd [#allocation3], 4294967040 }
  0x1f   :  { %2278 = dma.done.wait [#allocation6], 2304  }
  0x20   :  { %2279 = vsyncadd [#allocation6], 4294964992 }
  0x21   :  { %2280 = dma.done.wait [#allocation9], 544  }
  0x22   :  { %2281 = vsyncadd [#allocation9], 4294966752 }
  0x23   :  { %2282 = dma.done.wait [#allocation12], 4096  }
  0x24   :  { %2283 = vsyncadd [#allocation12], 4294963200 }
  0x25   :  { %2284 = dma.done.wait [#allocation15], 32  }
  0x26   :  { %2285 = vsyncadd [#allocation15], 4294967264  ;;  %v1869_v0 = vld [vmem:[#allocation7 + $0x38] sm:$0xff]  ;;  %v1868_v1 = vld [vmem:[#allocation7 + $0x30] sm:$0xff]  ;;  %s2302_s9 = smov 120   ;;  %s2303_s12 = smov 96  }
  0x27   :  { %240 = vmatpush.bf16.msra.mxu0 %v1869_v0  ;;  %v1867_v2 = vld [vmem:[#allocation7 + $0x28] sm:$0xff]  ;;  %v1866_v3 = vld [vmem:[#allocation7 + $0x20] sm:$0xff]  ;;  %v1865_v4 = vld [vmem:[#allocation7 + $0x18] sm:$0xff]  ;;  %s2304_s23 = smov 88   ;;  %vm263_vm0 = vcmask 64512   ;;  %vm288_vm1 = vcmask 130048  }
  0x28   :  { %v1864_v5 = vld [vmem:[#allocation7 + $0x10] sm:$0xff]  ;;  %v1863_v6 = vld [vmem:[#allocation7 + $0x8] sm:$0xff]  ;;  %v1862_v7 = vld [vmem:[#allocation7] sm:$0xff]  ;;  %s2305_s0 = smov 56   ;;  %s2306_s17 = smov 72   ;;  %vm573_vm2 = vcmask 195584  }
  0x29   :  { %v2430_v8 = vld [vmem:[#allocation2] sm:$0xff]  ;;  %v2432_v9 = vld [vmem:[#allocation2 + $0x8] sm:$0xff]  ;;  %v2449_v24 = vld [vmem:[#allocation5] sm:$0xff]  ;;  %s2307_s18 = smov 104   ;;  %s2308_s19 = smov 80   ;;  %vm597_vm3 = vcmask 261120  }
  0x2a   :  { %v175_v10 = vpack.c.bf16 %v2432_v9, %v2430_v8  ;;  %v2455_v34 = vld [vmem:[#allocation5 + $0x8] sm:$0xff]  ;;  %s2309_s20 = smov 112   ;;  %s2310_s21 = smov 48  }
  0x2b   :  { %241 = vmatpush.bf16.msra.mxu0 %v1868_v1  ;;  %s2311_s2 = smov 40   ;;  %s2312_s24 = smov 24  }
  0x2f   :  { %242 = vmatpush.bf16.msra.mxu0 %v1867_v2 }
  0x33   :  { %243 = vmatpush.bf16.msra.mxu0 %v1866_v3 }
  0x37   :  { %244 = vmatpush.bf16.msra.mxu0 %v1865_v4 }
  0x3b   :  { %245 = vmatpush.bf16.msra.mxu0 %v1864_v5 }
  0x3f   :  { %246 = vmatpush.bf16.msra.mxu0 %v1863_v6 }
  0x43   :  { %247 = vmatpush.bf16.msra.mxu0 %v1862_v7 }
  0x46   :  { %248 = vmatmul.bf16.vlgmr.msra.gmra.mxu0 %v175_v10 }
  0xc3   :  { %v249_v11 = vpop.f32.mrf.mxu0 }
  0xc4   :  { %v254_v12 = vpack.c.bf16 %v249_v11, %v249_v11 }
  0xc6   :  { %v258_v15 = vunpack.c.l.b16 %v254_v12 }
  0xcb   :  { %v251_v13 = vpop.f32.mrf.mxu0 }
  0xcc   :  { %v255_v14 = vpack.c.bf16 %v251_v13, %v251_v13 }
  0xce   :  { %v259_v16 = vunpack.c.l.b16 %v255_v14 }
  0xd0   :  { %v2436_v17 = vpack.c.b16 %v259_v16, %v258_v15 }
  0xd2   :  { %332 = vrot.lane.b32.xlu1 %v2436_v17, %s2302_s9  ;;  %261 = vrot.lane.b32.xlu0 %v2436_v17, %s2303_s12 }
  0xda   :  { %334 = vrot.lane.b32.xlu0 %v2436_v17, %s2304_s23 }
 0x144   :  { %v262_v18 = vpop.permute.xlu0 %261  ;;  %v333_v22 = vpop.permute.xlu1 %332 }
 0x145   :  { %v268_v19 = vsel %vm263_vm0, %v262_v18, 0 }
 0x146   :  { %277 = vmatpush.bf16.xpose.msra.mxu1 %v268_v19 }
 0x14c   :  { %v335_v20 = vpop.permute.xlu0 %334 }
 0x14d   :  { %1663 = vmatmul.msk.bf16.vlgmr.msra.gmra.mxu1 %vm263_vm0, %v2436_v17  ;;  %v340_v21 = vsel %vm263_vm0, %v335_v20, 0 }
 0x14e   :  { %349 = vmatpush.bf16.xpose.msra.mxu3 %v340_v21 }
 0x155   :  { %1665 = vmatmul.msk.bf16.vlgmr.msra.gmra.mxu3 %vm263_vm0, %v333_v22 }
 0x1ca   :  { %v279_v23 = vpop.f32.mrf.mxu1 }
 0x1cb   :  { %v284_v25 = vmul.f32 0.35355338, %v279_v23 }
 0x1cd   :  { %v286_v26 = vadd.f32 %v284_v25, %v2449_v24 }
 0x1cf   :  { %v289_v27 = vsel %vm288_vm1, %v286_v26, -inf }
 0x1d0   :  { %290 = vmax.xlane.f32.xlu1 %v289_v27 }
 0x1d2   :  { %v281_v30 = vpop.f32.mrf.mxu1 }
 0x1d3   :  { %v285_v32 = vmul.f32 0.35355338, %v281_v30 }
 0x1d5   :  { %v287_v37 = vadd.f32 %v285_v32, %v2455_v34 }
 0x1d7   :  { %v292_v40 = vsel %vm288_vm1, %v287_v37, -inf }
 0x1d8   :  { %v351_v28 = vpop.f32.mrf.mxu3 }
 0x1d9   :  { %v356_v29 = vmul.f32 0.35355338, %v351_v28 }
 0x1db   :  { %v358_v31 = vadd.f32 %v356_v29, %v2449_v24 }
 0x1dd   :  { %v360_v33 = vsel %vm288_vm1, %v358_v31, -inf }
 0x1de   :  { %361 = vmax.xlane.f32.xlu2 %v360_v33 }
 0x1e0   :  { %v353_v35 = vpop.f32.mrf.mxu3 }
 0x1e1   :  { %v357_v36 = vmul.f32 0.35355338, %v353_v35 }
 0x1e3   :  { %v359_v38 = vadd.f32 %v357_v36, %v2455_v34 }
 0x1e5   :  { %v363_v39 = vsel %vm288_vm1, %v359_v38, -inf }
 0x1e6   :  { %364 = vmax.xlane.f32.xlu0 %v363_v39  ;;  %293 = vmax.xlane.f32.xlu2 %v292_v40 }
 0x1fa   :  { %383 = vrot.lane.b32.xlu0 %v2436_v17, %s2305_s0 }
 0x202   :  { %476 = vrot.lane.b32.xlu0 %v2436_v17, %s2306_s17 }
 0x20a   :  { %474 = vrot.lane.b32.xlu0 %v2436_v17, %s2307_s18 }
 0x243   :  { %v291_v41 = vpop.xlane.xlu1 %290 }
 0x244   :  { %v295_v42 = vsub.f32 %v286_v26, %v291_v41 }
 0x246   :  { %v297_v43 = vmul.f32 1.442695, %v295_v42 }
 0x248   :  { %1980 = vpow2.f32 %v297_v43 }
 0x24e   :  { %v1981_v44 = vpop.eup %1980 }
 0x24f   :  { %v301_v45 = vsel %vm288_vm1, %v1981_v44, 0.0 }
 0x250   :  { %302 = vadd.xlane.f32.xlu2 %v301_v45 }
 0x251   :  { %v362_v46 = vpop.xlane.xlu2 %361 }
 0x252   :  { %v366_v47 = vsub.f32 %v358_v31, %v362_v46 }
 0x254   :  { %v368_v48 = vmul.f32 1.442695, %v366_v47 }
 0x256   :  { %1982 = vpow2.f32 %v368_v48 }
 0x259   :  { %v294_v49 = vpop.xlane.xlu2 %293  ;;  %v365_v56 = vpop.xlane.xlu0 %364 }
 0x25a   :  { %v296_v50 = vsub.f32 %v287_v37, %v294_v49  ;;  %v367_v57 = vsub.f32 %v359_v38, %v365_v56 }
 0x25c   :  { %v1983_v51 = vpop.eup %1982  ;;  %v299_v52 = vmul.f32 1.442695, %v296_v50  ;;  %v370_v58 = vmul.f32 1.442695, %v367_v57 }
 0x25d   :  { %v372_v53 = vsel %vm288_vm1, %v1983_v51, 0.0 }
 0x25e   :  { %373 = vadd.xlane.f32.xlu1 %v372_v53  ;;  %1984 = vpow2.f32 %v299_v52 }
 0x25f   :  { %1986 = vpow2.f32 %v370_v58 }
 0x264   :  { %v1985_v54 = vpop.eup %1984 }
 0x265   :  { %v304_v55 = vsel %vm288_vm1, %v1985_v54, 0.0  ;;  %v1987_v59 = vpop.eup %1986 }
 0x266   :  { %305 = vadd.xlane.f32.xlu2 %v304_v55  ;;  %v375_v60 = vsel %vm288_vm1, %v1987_v59, 0.0 }
 0x26c   :  { %v384_v62 = vpop.permute.xlu0 %383 }
 0x274   :  { %v477_v6 = vpop.permute.xlu0 %476 }
 0x275   :  { %v482_v10 = vsel %vm263_vm0, %v477_v6, 0 }
 0x277   :  { %405 = vrot.lane.b32.xlu1 %v2436_v17, %s2308_s19 }
 0x27c   :  { %v475_v21 = vpop.permute.xlu0 %474 }
 0x27e   :  { %312 = vrot.lane.b32.xlu2 %v2436_v17, %s2292_s22 }
 0x27f   :  { %403 = vrot.lane.b32.xlu1 %v2436_v17, %s2309_s20 }
 0x2a7   :  { %376 = vadd.xlane.f32.xlu2 %v375_v60 }
 0x2c3   :  { %v303_v61 = vpop.xlane.xlu2 %302 }
 0x2c4   :  { %1988 = vrcp.f32 %v303_v61 }
 0x2ca   :  { %v1989_v0 = vpop.eup %1988 }
 0x2cb   :  { %v309_v4 = vmul.f32 %v1989_v0, %v1981_v44 }
 0x2d1   :  { %v374_v2 = vpop.xlane.xlu1 %373 }
 0x2d9   :  { %v306_v63 = vpop.xlane.xlu2 %305 }
 0x2da   :  { %1990 = vrcp.f32 %v306_v63 }
 0x2db   :  { %1992 = vrcp.f32 %v374_v2 }
 0x2e0   :  { %v1991_v1 = vpop.eup %1990 }
 0x2e1   :  { %v313_v3 = vpop.permute.xlu2 %312  ;;  %v310_v5 = vmul.f32 %v1991_v1, %v1985_v54  ;;  %v1993_v15 = vpop.eup %1992 }
 0x2e2   :  { %325 = vmatpush.bf16.msra.mxu2 %v313_v3  ;;  %v380_v18 = vmul.f32 %v1993_v15, %v1983_v51 }
 0x2e3   :  { %v311_v7 = vpack.c.bf16 %v310_v5, %v309_v4 }
 0x2e5   :  { %1664 = vmatmul.msk.bf16.vlgmr.msra.gmra.mxu2 %vm288_vm1, %v311_v7 }
 0x2e6   :  { %396 = vmatpush.bf16.msrb.mxu2 %v384_v62 }
 0x2e9   :  { %v406_v11 = vpop.permute.xlu1 %405 }
 0x2ea   :  { %491 = vmatpush.bf16.xpose.msra.mxu2 %v482_v10  ;;  %v411_v12 = vsel %vm263_vm0, %v406_v11, 0 }
 0x2eb   :  { %420 = vmatpush.bf16.xpose.msrb.mxu1 %v411_v12 }
 0x2f1   :  { %v404_v13 = vpop.permute.xlu1 %403 }
 0x2f2   :  { %1667 = vmatmul.msk.bf16.vlgmr.msrb.gmra.mxu1 %vm263_vm0, %v404_v13 }
 0x31a   :  { %v377_v14 = vpop.xlane.xlu2 %376 }
 0x31b   :  { %1994 = vrcp.f32 %v377_v14 }
 0x321   :  { %v1995_v16 = vpop.eup %1994 }
 0x322   :  { %v381_v19 = vmul.f32 %v1995_v16, %v1987_v59 }
 0x324   :  { %v382_v20 = vpack.c.bf16 %v381_v19, %v380_v18 }
 0x326   :  { %1666 = vmatmul.msk.bf16.vlgmr.msrb.gmra.mxu2 %vm288_vm1, %v382_v20 }
 0x336   :  { %1669 = vmatmul.msk.bf16.vlgmr.msra.gmra.mxu2 %vm263_vm0, %v475_v21 }
 0x368   :  { %v2489_v31 = vpop.f32.mrf.mxu2 }
 0x36f   :  { %v422_v22 = vpop.f32.mrf.mxu1 }
 0x370   :  { %v427_v23 = vmul.f32 0.35355338, %v422_v22  ;;  %v2491_v32 = vpop.f32.mrf.mxu2 }
 0x372   :  { %v429_v25 = vadd.f32 %v427_v23, %v2449_v24 }
 0x374   :  { %v431_v26 = vsel %vm288_vm1, %v429_v25, -inf }
 0x375   :  { %432 = vmax.xlane.f32.xlu1 %v431_v26  ;;  %v1871_v26 = vld [vmem:[#allocation8 + $0x8] sm:$0xff] }
 0x377   :  { %v424_v27 = vpop.f32.mrf.mxu1 }
 0x378   :  { %v428_v28 = vmul.f32 0.35355338, %v424_v27  ;;  %v1870_v27 = vld [vmem:[#allocation8] sm:$0xff] }
 0x37a   :  { %v430_v29 = vadd.f32 %v428_v28, %v2455_v34 }
 0x37c   :  { %v434_v30 = vsel %vm288_vm1, %v430_v29, -inf }
 0x37d   :  { %435 = vmax.xlane.f32.xlu0 %v434_v30 }
 0x391   :  { %454 = vrot.lane.b32.xlu0 %v2436_v17, %s2310_s21 }
 0x3a9   :  { %v398_v33 = vpop.f32.mrf.mxu2 }
 0x3b1   :  { %v400_v35 = vpop.f32.mrf.mxu2 }
 0x3b2   :  { %v1940_v36 = vpack.i.bf16 %v400_v35, %v398_v33 }
 0x3b9   :  { %v493_v37 = vpop.f32.mrf.mxu2 }
 0x3ba   :  { %v498_v38 = vmul.f32 0.35355338, %v493_v37 }
 0x3bc   :  { %v500_v39 = vadd.f32 %v498_v38, %v2449_v24 }
 0x3be   :  { %v502_v40 = vsel %vm288_vm1, %v500_v39, -inf }
 0x3bf   :  { %503 = vmax.xlane.f32.xlu2 %v502_v40 }
 0x3c1   :  { %v495_v41 = vpop.f32.mrf.mxu2 }
 0x3c2   :  { %v499_v42 = vmul.f32 0.35355338, %v495_v41 }
 0x3c4   :  { %v501_v43 = vadd.f32 %v499_v42, %v2455_v34 }
 0x3c6   :  { %v505_v44 = vsel %vm288_vm1, %v501_v43, -inf }
 0x3c7   :  { %506 = vmax.xlane.f32.xlu2 %v505_v44 }
 0x3e8   :  { %v433_v45 = vpop.xlane.xlu1 %432 }
 0x3e9   :  { %v437_v46 = vsub.f32 %v429_v25, %v433_v45 }
 0x3eb   :  { %v439_v47 = vmul.f32 1.442695, %v437_v46 }
 0x3ed   :  { %1996 = vpow2.f32 %v439_v47 }
 0x3f0   :  { %v436_v48 = vpop.xlane.xlu0 %435 }
 0x3f1   :  { %v438_v49 = vsub.f32 %v430_v29, %v436_v48 }
 0x3f3   :  { %v1997_v50 = vpop.eup %1996  ;;  %v441_v51 = vmul.f32 1.442695, %v438_v49 }
 0x3f4   :  { %v443_v52 = vsel %vm288_vm1, %v1997_v50, 0.0 }
 0x3f5   :  { %1998 = vpow2.f32 %v441_v51  ;;  %444 = vadd.xlane.f32.xlu2 %v443_v52 }
 0x3fb   :  { %v1999_v53 = vpop.eup %1998 }
 0x3fc   :  { %v446_v54 = vsel %vm288_vm1, %v1999_v53, 0.0 }
 0x3fd   :  { %447 = vadd.xlane.f32.xlu2 %v446_v54 }
 0x403   :  { %v455_v55 = vpop.permute.xlu0 %454 }
 0x404   :  { %467 = vmatpush.bf16.msrb.mxu3 %v455_v55 }
 0x408   :  { %607 = vmatpush.bf16.msra.mxu3 %v1871_v26 }
 0x40c   :  { %608 = vmatpush.bf16.msra.mxu3 %v1870_v27 }
 0x432   :  { %v504_v56 = vpop.xlane.xlu2 %503 }
 0x433   :  { %v508_v57 = vsub.f32 %v500_v39, %v504_v56  ;;  %v1878_v56 = vld [vmem:[#allocation11 + $0x30] sm:$0xff] }
 0x435   :  { %v510_v58 = vmul.f32 1.442695, %v508_v57 }
 0x437   :  { %2000 = vpow2.f32 %v510_v58 }
 0x43a   :  { %v507_v59 = vpop.xlane.xlu2 %506 }
 0x43b   :  { %v509_v60 = vsub.f32 %v501_v43, %v507_v59  ;;  %v1877_v59 = vld [vmem:[#allocation11 + $0x28] sm:$0xff] }
 0x43d   :  { %v2001_v61 = vpop.eup %2000  ;;  %v512_v62 = vmul.f32 1.442695, %v509_v60 }
 0x43e   :  { %v514_v63 = vsel %vm288_vm1, %v2001_v61, 0.0 }
 0x43f   :  { %2002 = vpow2.f32 %v512_v62  ;;  %515 = vadd.xlane.f32.xlu2 %v514_v63  ;;  %v1876_v62 = vld [vmem:[#allocation11 + $0x20] sm:$0xff] }
 0x445   :  { %v2003_v0 = vpop.eup %2002 }
 0x446   :  { %v517_v1 = vsel %vm288_vm1, %v2003_v0, 0.0 }
 0x447   :  { %518 = vadd.xlane.f32.xlu1 %v517_v1  ;;  %v1875_v1 = vld [vmem:[#allocation11 + $0x18] sm:$0xff] }
 0x457   :  { %525 = vrot.lane.b32.xlu2 %v2436_v17, %s2311_s2 }
 0x460   :  { %1941 = vrot.lane.b32.xlu1 %v1940_v36, %s2290_s14 }
 0x468   :  { %v445_v2 = vpop.xlane.xlu2 %444 }
 0x469   :  { %2004 = vrcp.f32 %v445_v2 }
 0x46f   :  { %v2005_v4 = vpop.eup %2004 }
 0x470   :  { %v448_v3 = vpop.xlane.xlu2 %447  ;;  %v451_v6 = vmul.f32 %v2005_v4, %v1997_v50  ;;  %v1874_v4 = vld [vmem:[#allocation11 + $0x10] sm:$0xff] }
 0x471   :  { %2006 = vrcp.f32 %v448_v3 }
 0x477   :  { %v2007_v5 = vpop.eup %2006 }
 0x478   :  { %v452_v7 = vmul.f32 %v2007_v5, %v1999_v53  ;;  %v1879_v53 = vld [vmem:[#allocation11 + $0x38] sm:$0xff] }
 0x479   :  { %728 = vmatpush.bf16.msrb.mxu0 %v1879_v53 }
 0x47a   :  { %v453_v10 = vpack.c.bf16 %v452_v7, %v451_v6  ;;  %v1873_v7 = vld [vmem:[#allocation11 + $0x8] sm:$0xff] }
 0x47c   :  { %1668 = vmatmul.msk.bf16.vlgmr.msrb.gmra.mxu3 %vm288_vm1, %v453_v10 }
 0x47d   :  { %729 = vmatpush.bf16.msrb.mxu0 %v1878_v56 }
 0x481   :  { %730 = vmatpush.bf16.msrb.mxu0 %v1877_v59 }
 0x485   :  { %731 = vmatpush.bf16.msrb.mxu0 %v1876_v62 }
 0x489   :  { %732 = vmatpush.bf16.msrb.mxu0 %v1875_v1 }
 0x48d   :  { %733 = vmatpush.bf16.msrb.mxu0 %v1874_v4 }
 0x491   :  { %734 = vmatpush.bf16.msrb.mxu0 %v1873_v7 }
 0x4b2   :  { %v516_v11 = vpop.xlane.xlu2 %515 }
 0x4b3   :  { %2008 = vrcp.f32 %v516_v11 }
 0x4b9   :  { %v2009_v17 = vpop.eup %2008 }
 0x4ba   :  { %v519_v12 = vpop.xlane.xlu1 %518  ;;  %v526_v13 = vpop.permute.xlu2 %525  ;;  %v522_v15 = vmul.f32 %v2009_v17, %v2001_v61 }
 0x4bb   :  { %2010 = vrcp.f32 %v519_v12  ;;  %538 = vmatpush.bf16.msra.mxu1 %v526_v13  ;;  %v1872_v12 = vld [vmem:[#allocation11] sm:$0xff] }
 0x4bc   :  { %735 = vmatpush.bf16.msrb.mxu0 %v1872_v12 }
 0x4c1   :  { %v2011_v14 = vpop.eup %2010 }
 0x4c2   :  { %v523_v16 = vmul.f32 %v2011_v14, %v2003_v0 }
 0x4c4   :  { %v524_v18 = vpack.c.bf16 %v523_v16, %v522_v15 }
 0x4c6   :  { %1670 = vmatmul.msk.bf16.vlgmr.msra.gmra.mxu1 %vm288_vm1, %v524_v18 }
 0x4d2   :  { %v1942_v28 = vpop.permute.xlu1 %1941 }
 0x4d3   :  { %v1944_v30 = vunpack.i.h.bf16 %v1942_v28  ;;  %v1943_v33 = vunpack.i.l.bf16 %v1942_v28  ;;  %v1971_v28 = vld [vmem:[#allocation10] ss:$0 sm:$0xff] }
 0x4d5   :  { %v570_v38 = vsel %vm263_vm0, %v2491_v32, %v1944_v30  ;;  %v569_v39 = vsel %vm263_vm0, %v2489_v31, %v1943_v33  ;;  %v1970_v32 = vld [vmem:[%s2642_s4] ss:$0 sm:$0xff] }
 0x4ff   :  { %v469_v19 = vpop.f32.mrf.mxu3 }
 0x507   :  { %v471_v20 = vpop.f32.mrf.mxu3 }
 0x508   :  { %v1945_v21 = vpack.i.bf16 %v471_v20, %v469_v19 }
 0x50a   :  { %1946 = vrot.lane.b32.xlu0 %v1945_v21, %s2298_s1 }
 0x543   :  { %v540_v22 = vpop.f32.mrf.mxu1 }
 0x54b   :  { %v542_v23 = vpop.f32.mrf.mxu1 }
 0x54c   :  { %v1950_v25 = vpack.i.bf16 %v542_v23, %v540_v22  ;;  %v648_v23 = vld [vmem:[%s2643_s5] sm:$0x1] }
 0x54e   :  { %1951 = vrot.lane.b32.xlu2 %v1950_v25, %s2312_s24 }
 0x57c   :  { %v1947_v29 = vpop.permute.xlu0 %1946 }
 0x57d   :  { %v1949_v35 = vunpack.i.h.bf16 %v1947_v29  ;;  %v1948_v36 = vunpack.i.l.bf16 %v1947_v29 }
 0x57f   :  { %v572_v42 = vsel %vm288_vm1, %v570_v38, %v1949_v35  ;;  %v571_v43 = vsel %vm288_vm1, %v569_v39, %v1948_v36  ;;  %v1886_v38 = vld [vmem:[#allocation13 + $0x30] sm:$0xff]  ;;  %v1885_v39 = vld [vmem:[#allocation13 + $0x28] sm:$0xff] }
 0x5a8   :  { %v1952_v37 = vpop.permute.xlu2 %1951 }
 0x5a9   :  { %v1954_v40 = vunpack.i.h.bf16 %v1952_v37  ;;  %v1953_v41 = vunpack.i.l.bf16 %v1952_v37  ;;  %v1887_v37 = vld [vmem:[#allocation13 + $0x38] sm:$0xff] }
 0x5aa   :  { %829 = vmatpush.bf16.msrb.mxu2 %v1887_v37 }
 0x5ab   :  { %v574_v44 = vsel %vm573_vm2, %v571_v43, %v1953_v41  ;;  %v575_v45 = vsel %vm573_vm2, %v572_v42, %v1954_v40  ;;  %v1884_v40 = vld [vmem:[#allocation13 + $0x20] sm:$0xff]  ;;  %v1883_v41 = vld [vmem:[#allocation13 + $0x18] sm:$0xff]  ;;  %v1882_v42 = vld [vmem:[#allocation13 + $0x10] sm:$0xff] }
 0x5ac   :  { %v576_v46 = vpack.c.bf16 %v575_v45, %v574_v44  ;;  %v1881_v43 = vld [vmem:[#allocation13 + $0x8] sm:$0xff]  ;;  %v1880_v44 = vld [vmem:[#allocation13] sm:$0xff]  ;;  %v1972_v45 = vld [vmem:[%s2646_s8] ss:$0 sm:$0xff] }
 0x5ae   :  { %1679 = vmatmul.msk.bf16.vlgmr.msra.gmra.mxu3 %vm597_vm3, %v576_v46  ;;  %830 = vmatpush.bf16.msrb.mxu2 %v1886_v38  ;;  %v1888_v38 = vld [vmem:[#allocation7 + $0x40] sm:$0xff] }
 0x5b2   :  { %831 = vmatpush.bf16.msrb.mxu2 %v1885_v39 }
 0x5b6   :  { %832 = vmatpush.bf16.msrb.mxu2 %v1884_v40 }
 0x5ba   :  { %833 = vmatpush.bf16.msrb.mxu2 %v1883_v41 }
 0x5be   :  { %834 = vmatpush.bf16.msrb.mxu2 %v1882_v42 }
 0x5c2   :  { %835 = vmatpush.bf16.msrb.mxu2 %v1881_v43 }
 0x5c6   :  { %836 = vmatpush.bf16.msrb.mxu2 %v1880_v44 }
 0x631   :  { %v610_v47 = vpop.f32.mrf.mxu3 }
 0x632   :  { %v611_v31 = vadd.f32 %v1970_v32, %v610_v47 }
 0x634   :  { %v615_v50 = vadd.f32 %v611_v31, %v2430_v8 }
 0x639   :  { %v612_v48 = vpop.f32.mrf.mxu3 }
 0x63a   :  { %v613_v49 = vadd.f32 %v1970_v32, %v612_v48 }
 0x63c   :  { %v616_v51 = vadd.f32 %v613_v49, %v2432_v9 }
 0x63e   :  { %v617_v52 = vadd.f32 %v616_v51, %v615_v50 }
 0x640   :  { %v618_v54 = vrot.slane %v617_v52, 4 }
 0x642   :  { %v619_v55 = vadd.f32 %v618_v54, %v617_v52 }
 0x644   :  { %v620_v57 = vrot.slane %v619_v55, 2 }
 0x646   :  { %v621_v58 = vadd.f32 %v620_v57, %v619_v55 }
 0x648   :  { %v622_v60 = vrot.slane %v621_v58, 1 }
 0x64a   :  { %v623_v61 = vadd.f32 %v622_v60, %v621_v58 }
 0x64c   :  { %v624_v63 = vmul.f32 0.0625, %v623_v61 }
 0x64e   :  { %v625_v0 = vsub.f32 %v615_v50, %v624_v63  ;;  %v626_v8 = vsub.f32 %v616_v51, %v624_v63 }
 0x650   :  { %v627_v9 = vmul.f32 %v625_v0, %v625_v0  ;;  %v628_v2 = vmul.f32 %v626_v8, %v626_v8 }
 0x652   :  { %v629_v3 = vadd.f32 %v628_v2, %v627_v9  ;;  %v1973_v2 = vld [vmem:[%s2648_s10] ss:$0 sm:$0xff] }
 0x654   :  { %v630_v5 = vrot.slane %v629_v3, 4 }
 0x656   :  { %v631_v6 = vadd.f32 %v630_v5, %v629_v3 }
 0x658   :  { %v632_v10 = vrot.slane %v631_v6, 2 }
 0x65a   :  { %v633_v11 = vadd.f32 %v632_v10, %v631_v6 }
 0x65c   :  { %v634_v13 = vrot.slane %v633_v11, 1 }
 0x65e   :  { %v635_v17 = vadd.f32 %v634_v13, %v633_v11  ;;  %v1895_v11 = vld [vmem:[#allocation7 + $0x78] sm:$0xff] }
 0x65f   :  { %953 = vmatpush.bf16.msrb.mxu1 %v1895_v11 }
 0x660   :  { %v636_v14 = vmul.f32 0.0625, %v635_v17  ;;  %v1894_v17 = vld [vmem:[#allocation7 + $0x70] sm:$0xff] }
 0x662   :  { %v637_v15 = vadd.f32 1e-05, %v636_v14 }
 0x663   :  { %954 = vmatpush.bf16.msrb.mxu1 %v1894_v17 }
 0x664   :  { %2012 = vrsqrt.f32 %v637_v15  ;;  %vm644_vm5 = vweird.f32 %v637_v15 }
 0x66a   :  { %v2013_v16 = vpop.eup %2012 }
 0x66b   :  { %v639_v18 = vmul.f32 %v2013_v16, %v637_v15  ;;  %vm645_vm4 = vweird.f32 %v2013_v16 }
 0x66c   :  { %vm646_vm6 = vmor %vm644_vm5, %vm645_vm4 }
 0x66d   :  { %v640_v19 = vmul.f32 %v2013_v16, %v639_v18 }
 0x66f   :  { %v641_v20 = vmul.f32 0.5, %v640_v19 }
 0x671   :  { %v642_v21 = vsub.f32 1.5, %v641_v20  ;;  %v1892_v20 = vld [vmem:[#allocation7 + $0x60] sm:$0xff] }
 0x673   :  { %v643_v22 = vmul.f32 %v2013_v16, %v642_v21 }
 0x675   :  { %v647_v25 = vsel %vm646_vm6, %v2013_v16, %v643_v22  ;;  %v1893_v16 = vld [vmem:[#allocation7 + $0x68] sm:$0xff] }
 0x676   :  { %v649_v26 = vmul.f32 %v648_v23, %v647_v25  ;;  %955 = vmatpush.bf16.msrb.mxu1 %v1893_v16  ;;  %v1891_v25 = vld [vmem:[#allocation7 + $0x58] sm:$0xff] }
 0x678   :  { %v650_v27 = vperm.slane %v649_v26, 0 }
 0x67a   :  { %v652_v29 = vmul.f32 %v650_v27, %v626_v8  ;;  %v651_v30 = vmul.f32 %v650_v27, %v625_v0  ;;  %956 = vmatpush.bf16.msrb.mxu1 %v1892_v20 }
 0x67c   :  { %v657_v33 = vadd.f32 %v1971_v28, %v651_v30  ;;  %v658_v35 = vadd.f32 %v1971_v28, %v652_v29  ;;  %v1890_v29 = vld [vmem:[#allocation7 + $0x50] sm:$0xff] }
 0x67e   :  { %v659_v36 = vpack.c.bf16 %v658_v35, %v657_v33  ;;  %957 = vmatpush.bf16.msrb.mxu1 %v1891_v25 }
 0x680   :  { %736 = vmatmul.bf16.vlgmr.msrb.gmra.mxu0 %v659_v36 }
 0x682   :  { %958 = vmatpush.bf16.msrb.mxu1 %v1890_v29 }
 0x6fd   :  { %v737_v46 = vpop.f32.mrf.mxu0 }
 0x6fe   :  { %v738_v47 = vadd.f32 %v1972_v45, %v737_v46 }
 0x700   :  { %v744_v32 = vmul.f32 %v738_v47, %v738_v47  ;;  %v742_v61 = vmul.f32 0.5, %v738_v47 }
 0x702   :  { %v746_v31 = vmul.f32 %v744_v32, %v738_v47 }
 0x704   :  { %v748_v48 = vmul.f32 0.044715, %v746_v31  ;;  %v876_v31 = vld [vmem:[%s2649_s11] sm:$0x1] }
 0x705   :  { %v739_v49 = vpop.f32.mrf.mxu0 }
 0x706   :  { %v750_v50 = vadd.f32 %v748_v48, %v738_v47  ;;  %v740_v51 = vadd.f32 %v1972_v45, %v739_v49 }
 0x708   :  { %v745_v52 = vmul.f32 %v740_v51, %v740_v51  ;;  %v752_v53 = vmul.f32 0.7978846, %v750_v50  ;;  %v743_v62 = vmul.f32 0.5, %v740_v51 }
 0x70a   :  { %v747_v54 = vmul.f32 %v745_v52, %v740_v51  ;;  %2014 = vtanh.f32 %v752_v53 }
 0x70c   :  { %v749_v55 = vmul.f32 0.044715, %v747_v54 }
 0x70e   :  { %v751_v56 = vadd.f32 %v749_v55, %v740_v51  ;;  %v1974_v51 = vld [vmem:[#allocation14] ss:$0 sm:$0xff] }
 0x710   :  { %v753_v57 = vmul.f32 0.7978846, %v751_v56  ;;  %v2015_v58 = vpop.eup %2014 }
 0x711   :  { %v756_v59 = vadd.f32 1.0, %v2015_v58 }
 0x712   :  { %2016 = vtanh.f32 %v753_v57 }
 0x713   :  { %v758_v0 = vmul.f32 %v756_v59, %v742_v61 }
 0x718   :  { %v2017_v60 = vpop.eup %2016 }
 0x719   :  { %v757_v63 = vadd.f32 1.0, %v2017_v60 }
 0x71b   :  { %v759_v8 = vmul.f32 %v757_v63, %v743_v62 }
 0x71d   :  { %v760_v1 = vpack.c.bf16 %v759_v8, %v758_v0 }
 0x71f   :  { %837 = vmatmul.bf16.vlgmr.msrb.gmra.mxu2 %v760_v1 }
 0x7a2   :  { %v838_v9 = vpop.f32.mrf.mxu2 }
 0x7a3   :  { %v839_v3 = vadd.f32 %v1973_v2, %v838_v9 }
 0x7a5   :  { %v843_v6 = vadd.f32 %v839_v3, %v657_v33 }
 0x7aa   :  { %v840_v4 = vpop.f32.mrf.mxu2 }
 0x7ab   :  { %v841_v5 = vadd.f32 %v1973_v2, %v840_v4 }
 0x7ad   :  { %v844_v7 = vadd.f32 %v841_v5, %v658_v35  ;;  %v1889_v35 = vld [vmem:[#allocation7 + $0x48] sm:$0xff] }
 0x7ae   :  { %959 = vmatpush.bf16.msrb.mxu1 %v1889_v35 }
 0x7af   :  { %v845_v10 = vadd.f32 %v844_v7, %v843_v6 }
 0x7b1   :  { %v846_v12 = vrot.slane %v845_v10, 4 }
 0x7b2   :  { %960 = vmatpush.bf16.msrb.mxu1 %v1888_v38 }
 0x7b3   :  { %v847_v13 = vadd.f32 %v846_v12, %v845_v10 }
 0x7b5   :  { %v848_v14 = vrot.slane %v847_v13, 2 }
 0x7b7   :  { %v849_v15 = vadd.f32 %v848_v14, %v847_v13 }
 0x7b9   :  { %v850_v18 = vrot.slane %v849_v15, 1 }
 0x7bb   :  { %v851_v19 = vadd.f32 %v850_v18, %v849_v15 }
 0x7bd   :  { %v852_v21 = vmul.f32 0.0625, %v851_v19 }
 0x7bf   :  { %v853_v22 = vsub.f32 %v843_v6, %v852_v21  ;;  %v854_v23 = vsub.f32 %v844_v7, %v852_v21 }
 0x7c1   :  { %v855_v26 = vmul.f32 %v853_v22, %v853_v22  ;;  %v856_v27 = vmul.f32 %v854_v23, %v854_v23 }
 0x7c3   :  { %v857_v28 = vadd.f32 %v856_v27, %v855_v26 }
 0x7c5   :  { %v858_v30 = vrot.slane %v857_v28, 4 }
 0x7c7   :  { %v859_v33 = vadd.f32 %v858_v30, %v857_v28 }
 0x7c9   :  { %v860_v36 = vrot.slane %v859_v33, 2 }
 0x7cb   :  { %v861_v37 = vadd.f32 %v860_v36, %v859_v33 }
 0x7cd   :  { %v862_v39 = vrot.slane %v861_v37, 1 }
 0x7cf   :  { %v863_v40 = vadd.f32 %v862_v39, %v861_v37 }
 0x7d1   :  { %v864_v41 = vmul.f32 0.0625, %v863_v40 }
 0x7d3   :  { %v865_v42 = vadd.f32 1e-05, %v864_v41 }
 0x7d5   :  { %2018 = vrsqrt.f32 %v865_v42  ;;  %vm872_vm8 = vweird.f32 %v865_v42 }
 0x7db   :  { %v2019_v43 = vpop.eup %2018 }
 0x7dc   :  { %v867_v44 = vmul.f32 %v2019_v43, %v865_v42  ;;  %vm873_vm7 = vweird.f32 %v2019_v43 }
 0x7dd   :  { %vm874_vm9 = vmor %vm872_vm8, %vm873_vm7 }
 0x7de   :  { %v868_v45 = vmul.f32 %v2019_v43, %v867_v44 }
 0x7e0   :  { %v869_v46 = vmul.f32 0.5, %v868_v45 }
 0x7e2   :  { %v870_v47 = vsub.f32 1.5, %v869_v46 }
 0x7e4   :  { %v871_v32 = vmul.f32 %v2019_v43, %v870_v47 }
 0x7e6   :  { %v875_v48 = vsel %vm874_vm9, %v2019_v43, %v871_v32 }
 0x7e7   :  { %v877_v49 = vmul.f32 %v876_v31, %v875_v48 }
 0x7e9   :  { %v878_v50 = vperm.slane %v877_v49, 0 }
 0x7eb   :  { %v879_v52 = vmul.f32 %v878_v50, %v853_v22  ;;  %v880_v53 = vmul.f32 %v878_v50, %v854_v23 }
 0x7ed   :  { %v2534_v54 = vadd.f32 %v1974_v51, %v880_v53  ;;  %v2536_v55 = vadd.f32 %v1974_v51, %v879_v52 }
 0x7ef   :  { %v887_v56 = vpack.c.bf16 %v2534_v54, %v2536_v55 }
 0x7f1   :  { %961 = vmatmul.bf16.vlgmr.msrb.gmra.mxu1 %v887_v56 }
 0x86e   :  { %v962_v57 = vpop.f32.mrf.mxu1 }
 0x86f   :  { %v967_v58 = vpack.c.bf16 %v962_v57, %v962_v57 }
 0x871   :  { %v971_v61 = vunpack.c.l.b16 %v967_v58 }
 0x876   :  { %v964_v59 = vpop.f32.mrf.mxu1 }
 0x877   :  { %v968_v60 = vpack.c.bf16 %v964_v59, %v964_v59 }
 0x879   :  { %v972_v62 = vunpack.c.l.b16 %v968_v60 }
 0x87b   :  { %v2540_v63 = vpack.c.b16 %v972_v62, %v971_v61 }
 0x87d   :  { %1043 = vrot.lane.b32.xlu2 %v2540_v63, %s2302_s9  ;;  %1045 = vrot.lane.b32.xlu1 %v2540_v63, %s2304_s23 }
 0x87e   :  { %974 = vrot.lane.b32.xlu0 %v2540_v63, %s2303_s12 }
 0x885   :  { %1114 = vrot.lane.b32.xlu2 %v2540_v63, %s2309_s20  ;;  %1187 = vrot.lane.b32.xlu1 %v2540_v63, %s2306_s17  ;;  %s2313_s17 = smov [#allocation16]  }
 0x886   :  { %1116 = vrot.lane.b32.xlu0 %v2540_v63, %s2308_s19 }
 0x88e   :  { %1185 = vrot.lane.b32.xlu0 %v2540_v63, %s2307_s18  ;;  %s1612_s18 = sshll.u32 %s2313_s17, 4  ;;  %s1613_s18 = int_to_ptr.vmem [resolvable:$true] %s1612_s18 }
 0x8d7   :  { %v1044_v2 = vpop.permute.xlu2 %1043 }
 0x8df   :  { %v1115_v7 = vpop.permute.xlu2 %1114 }
 0x8ef   :  { %v1046_v0 = vpop.permute.xlu1 %1045 }
 0x8f0   :  { %v1051_v8 = vsel %vm263_vm0, %v1046_v0, 0  ;;  %v975_v1 = vpop.permute.xlu0 %974 }
 0x8f1   :  { %v980_v9 = vsel %vm263_vm0, %v975_v1, 0  ;;  %1060 = vmatpush.bf16.xpose.msra.mxu2 %v1051_v8 }
 0x8f2   :  { %989 = vmatpush.bf16.xpose.msrb.mxu3 %v980_v9 }
 0x8f7   :  { %v1188_v3 = vpop.permute.xlu1 %1187 }
 0x8f8   :  { %v1193_v4 = vsel %vm263_vm0, %v1188_v3, 0  ;;  %v1117_v5 = vpop.permute.xlu0 %1116  ;;  %1778 = vmatmul.msk.bf16.vlgmr.msra.gmra.mxu2 %vm263_vm0, %v1044_v2 }
 0x8f9   :  { %v1122_v6 = vsel %vm263_vm0, %v1117_v5, 0  ;;  %1776 = vmatmul.msk.bf16.vlgmr.msrb.gmra.mxu3 %vm263_vm0, %v2540_v63  ;;  %1202 = vmatpush.bf16.xpose.msra.mxu0 %v1193_v4 }
 0x8fa   :  { %1131 = vmatpush.bf16.xpose.msra.mxu1 %v1122_v6 }
 0x900   :  { %v1186_v10 = vpop.permute.xlu0 %1185 }
 0x901   :  { %1780 = vmatmul.msk.bf16.vlgmr.msra.gmra.mxu1 %vm263_vm0, %v1115_v7  ;;  %1782 = vmatmul.msk.bf16.vlgmr.msra.gmra.mxu0 %vm263_vm0, %v1186_v10 }
 0x97b   :  { %v1062_v11 = vpop.f32.mrf.mxu2 }
 0x97c   :  { %v991_v12 = vpop.f32.mrf.mxu3  ;;  %v1067_v13 = vmul.f32 0.35355338, %v1062_v11 }
 0x97d   :  { %v996_v17 = vmul.f32 0.35355338, %v991_v12 }
 0x97e   :  { %v1133_v14 = vpop.f32.mrf.mxu1  ;;  %v1204_v15 = vpop.f32.mrf.mxu0  ;;  %v1069_v16 = vadd.f32 %v1067_v13, %v2449_v24 }
 0x97f   :  { %v998_v18 = vadd.f32 %v996_v17, %v2449_v24  ;;  %v1209_v20 = vmul.f32 0.35355338, %v1204_v15  ;;  %v1138_v30 = vmul.f32 0.35355338, %v1133_v14 }
 0x980   :  { %v1071_v19 = vsel %vm288_vm1, %v1069_v16, -inf }
 0x981   :  { %1072 = vmax.xlane.f32.xlu0 %v1071_v19  ;;  %v1000_v21 = vsel %vm288_vm1, %v998_v18, -inf  ;;  %v1211_v25 = vadd.f32 %v1209_v20, %v2449_v24  ;;  %v1140_v39 = vadd.f32 %v1138_v30, %v2449_v24 }
 0x982   :  { %1001 = vmax.xlane.f32.xlu1 %v1000_v21 }
 0x983   :  { %v1064_v26 = vpop.f32.mrf.mxu2  ;;  %v1213_v36 = vsel %vm288_vm1, %v1211_v25, -inf  ;;  %v1142_v43 = vsel %vm288_vm1, %v1140_v39, -inf }
 0x984   :  { %v993_v22 = vpop.f32.mrf.mxu3  ;;  %v1068_v33 = vmul.f32 0.35355338, %v1064_v26 }
 0x985   :  { %v997_v23 = vmul.f32 0.35355338, %v993_v22 }
 0x986   :  { %v1135_v27 = vpop.f32.mrf.mxu1  ;;  %v1070_v40 = vadd.f32 %v1068_v33, %v2455_v34  ;;  %v1206_v41 = vpop.f32.mrf.mxu0 }
 0x987   :  { %v1139_v28 = vmul.f32 0.35355338, %v1135_v27  ;;  %v999_v29 = vadd.f32 %v997_v23, %v2455_v34  ;;  %v1210_v42 = vmul.f32 0.35355338, %v1206_v41 }
 0x988   :  { %v1074_v44 = vsel %vm288_vm1, %v1070_v40, -inf }
 0x989   :  { %v1003_v35 = vsel %vm288_vm1, %v999_v29, -inf  ;;  %v1141_v37 = vadd.f32 %v1139_v28, %v2455_v34  ;;  %v1212_v45 = vadd.f32 %v1210_v42, %v2455_v34 }
 0x98a   :  { %1004 = vmax.xlane.f32.xlu2 %v1003_v35  ;;  %1214 = vmax.xlane.f32.xlu1 %v1213_v36 }
 0x98b   :  { %v1145_v38 = vsel %vm288_vm1, %v1141_v37, -inf  ;;  %v1216_v46 = vsel %vm288_vm1, %v1212_v45, -inf }
 0x98c   :  { %1146 = vmax.xlane.f32.xlu0 %v1145_v38 }
 0x992   :  { %1143 = vmax.xlane.f32.xlu2 %v1142_v43  ;;  %1075 = vmax.xlane.f32.xlu1 %v1074_v44 }
 0x99a   :  { %1217 = vmax.xlane.f32.xlu2 %v1216_v46 }
 0x9f4   :  { %v1073_v47 = vpop.xlane.xlu0 %1072 }
 0x9f5   :  { %v1002_v32 = vpop.xlane.xlu1 %1001  ;;  %v1077_v31 = vsub.f32 %v1069_v16, %v1073_v47 }
 0x9f6   :  { %v1006_v48 = vsub.f32 %v998_v18, %v1002_v32 }
 0x9f7   :  { %v1079_v24 = vmul.f32 1.442695, %v1077_v31 }
 0x9f8   :  { %v1008_v49 = vmul.f32 1.442695, %v1006_v48 }
 0x9f9   :  { %2020 = vpow2.f32 %v1079_v24 }
 0x9fa   :  { %2022 = vpow2.f32 %v1008_v49 }
 0x9fd   :  { %v1005_v50 = vpop.xlane.xlu2 %1004  ;;  %v1215_v1 = vpop.xlane.xlu1 %1214 }
 0x9fe   :  { %v1007_v51 = vsub.f32 %v999_v29, %v1005_v50  ;;  %v1219_v3 = vsub.f32 %v1211_v25, %v1215_v1 }
 0x9ff   :  { %v2581_v52 = vpop.eup %2020  ;;  %v1147_v58 = vpop.xlane.xlu0 %1146 }
 0xa00   :  { %v2023_v53 = vpop.eup %2022  ;;  %v1010_v56 = vmul.f32 1.442695, %v1007_v51  ;;  %v1083_v34 = vsel %vm288_vm1, %v2581_v52, 0.0  ;;  %v1149_v62 = vsub.f32 %v1141_v37, %v1147_v58  ;;  %v1221_v5 = vmul.f32 1.442695, %v1219_v3 }
 0xa01   :  { %v1012_v57 = vsel %vm288_vm1, %v2023_v53, 0.0  ;;  %1084 = vadd.xlane.f32.xlu2 %v1083_v34 }
 0xa02   :  { %2024 = vpow2.f32 %v1010_v56  ;;  %1013 = vadd.xlane.f32.xlu0 %v1012_v57  ;;  %v1152_v9 = vmul.f32 1.442695, %v1149_v62 }
 0xa05   :  { %v1144_v59 = vpop.xlane.xlu2 %1143  ;;  %v1076_v6 = vpop.xlane.xlu1 %1075 }
 0xa06   :  { %v1148_v60 = vsub.f32 %v1140_v39, %v1144_v59  ;;  %v1078_v10 = vsub.f32 %v1070_v40, %v1076_v6 }
 0xa08   :  { %v2025_v61 = vpop.eup %2024  ;;  %v1150_v0 = vmul.f32 1.442695, %v1148_v60  ;;  %v1081_v12 = vmul.f32 1.442695, %v1078_v10 }
 0xa09   :  { %v1015_v8 = vsel %vm288_vm1, %v2025_v61, 0.0 }
 0xa0a   :  { %2026 = vpow2.f32 %v1150_v0  ;;  %1016 = vadd.xlane.f32.xlu1 %v1015_v8 }
 0xa0b   :  { %2028 = vpow2.f32 %v1152_v9  ;;  %v1897_v9 = vld [vmem:[#allocation8 + $0x18] sm:$0xff] }
 0xa0c   :  { %2030 = vpow2.f32 %v1221_v5  ;;  %1318 = vmatpush.bf16.msrb.mxu1 %v1897_v9  ;;  %v1976_v9 = vld [vmem:[#allocation10 + $0x1] ss:$0 sm:$0xff] }
 0xa0d   :  { %2032 = vpow2.f32 %v1081_v12  ;;  %v1218_v16 = vpop.xlane.xlu2 %1217 }
 0xa0e   :  { %v1220_v18 = vsub.f32 %v1212_v45, %v1218_v16 }
 0xa10   :  { %v2027_v2 = vpop.eup %2026  ;;  %v1223_v19 = vmul.f32 1.442695, %v1220_v18 }
 0xa11   :  { %v1154_v4 = vsel %vm288_vm1, %v2027_v2, 0.0  ;;  %v2029_v7 = vpop.eup %2028 }
 0xa12   :  { %1155 = vadd.xlane.f32.xlu0 %v1154_v4  ;;  %v1157_v11 = vsel %vm288_vm1, %v2029_v7, 0.0  ;;  %v2031_v13 = vpop.eup %2030  ;;  %2034 = vpow2.f32 %v1223_v19 }
 0xa13   :  { %v1225_v17 = vsel %vm288_vm1, %v2031_v13, 0.0  ;;  %v2033_v14 = vpop.eup %2032 }
 0xa14   :  { %v1086_v15 = vsel %vm288_vm1, %v2033_v14, 0.0 }
 0xa18   :  { %v2035_v20 = vpop.eup %2034 }
 0xa19   :  { %1094 = vrot.lane.b32.xlu2 %v2540_v63, %s2305_s0  ;;  %v1228_v21 = vsel %vm288_vm1, %v2035_v20, 0.0 }
 0xa1a   :  { %1158 = vadd.xlane.f32.xlu0 %v1157_v11 }
 0xa21   :  { %1165 = vrot.lane.b32.xlu2 %v2540_v63, %s2310_s21  ;;  %s1614_s21 = sshll.u32 %s2651_s13, 4  ;;  %s1615_s21 = int_to_ptr.hbm [resolvable:$true] %s1614_s21 }
 0xa22   :  { %1226 = vadd.xlane.f32.xlu0 %v1225_v17 }
 0xa23   :  { %1023 = vrot.lane.b32.xlu1 %v2540_v63, %s2292_s22 }
 0xa2a   :  { %1087 = vadd.xlane.f32.xlu0 %v1086_v15 }
 0xa3e   :  { %1236 = vrot.lane.b32.xlu0 %v2540_v63, %s2311_s2 }
 0xa4d   :  { %1229 = vadd.xlane.f32.xlu1 %v1228_v21 }
 0xa74   :  { %v1085_v22 = vpop.xlane.xlu2 %1084 }
 0xa75   :  { %v1014_v25 = vpop.xlane.xlu0 %1013 }
 0xa7c   :  { %v1095_v23 = vpop.permute.xlu2 %1094 }
 0xa7d   :  { %1107 = vmatpush.bf16.msrb.mxu2 %v1095_v23  ;;  %v1017_v27 = vpop.xlane.xlu1 %1016 }
 0xa7e   :  { %2036 = vrcp.f32 %v1017_v27 }
 0xa7f   :  { %2038 = vrcp.f32 %v1014_v25 }
 0xa84   :  { %v2037_v29 = vpop.eup %2036  ;;  %v1166_v37 = vpop.permute.xlu2 %1165 }
 0xa85   :  { %v1156_v26 = vpop.xlane.xlu0 %1155  ;;  %v2039_v30 = vpop.eup %2038  ;;  %v1021_v33 = vmul.f32 %v2037_v29, %v2025_v61 }
 0xa86   :  { %v1020_v35 = vmul.f32 %v2039_v30, %v2023_v53 }
 0xa88   :  { %v1022_v38 = vpack.c.bf16 %v1021_v33, %v1020_v35  ;;  %v1905_v33 = vld [vmem:[#allocation11 + $0x78] sm:$0xff] }
 0xa8d   :  { %v1159_v28 = vpop.xlane.xlu0 %1158 }
 0xa8e   :  { %2040 = vrcp.f32 %v1159_v28 }
 0xa8f   :  { %2042 = vrcp.f32 %v1085_v22  ;;  %v1975_v22 = vld [vmem:[%s2642_s4 + $0x1] ss:$0 sm:$0xff] }
 0xa90   :  { %2044 = vrcp.f32 %v1156_v26 }
 0xa94   :  { %v2041_v40 = vpop.eup %2040 }
 0xa95   :  { %v1024_v63 = vpop.permute.xlu1 %1023  ;;  %v1227_v36 = vpop.xlane.xlu0 %1226  ;;  %v1163_v43 = vmul.f32 %v2041_v40, %v2029_v7 }
 0xa96   :  { %1036 = vmatpush.bf16.msra.mxu3 %v1024_v63  ;;  %v2043_v41 = vpop.eup %2042 }
 0xa97   :  { %v2045_v42 = vpop.eup %2044  ;;  %v1091_v45 = vmul.f32 %v2043_v41, %v2581_v52 }
 0xa98   :  { %v1162_v46 = vmul.f32 %v2045_v42, %v2027_v2  ;;  %v1896_v2 = vld [vmem:[#allocation8 + $0x10] sm:$0xff]  ;;  %v1902_v42 = vld [vmem:[#allocation11 + $0x60] sm:$0xff] }
 0xa99   :  { %1777 = vmatmul.msk.bf16.vlgmr.msra.gmra.mxu3 %vm288_vm1, %v1022_v38  ;;  %1319 = vmatpush.bf16.msrb.mxu1 %v1896_v2 }
 0xa9a   :  { %1178 = vmatpush.bf16.msrb.mxu3 %v1166_v37  ;;  %v1164_v32 = vpack.c.bf16 %v1163_v43, %v1162_v46 }
 0xa9d   :  { %v1088_v39 = vpop.xlane.xlu0 %1087 }
 0xa9e   :  { %2046 = vrcp.f32 %v1088_v39  ;;  %1443 = vmatpush.bf16.msra.mxu3 %v1905_v33  ;;  %v1903_v39 = vld [vmem:[#allocation11 + $0x68] sm:$0xff] }
 0xa9f   :  { %2048 = vrcp.f32 %v1227_v36  ;;  %v1904_v36 = vld [vmem:[#allocation11 + $0x70] sm:$0xff] }
 0xaa2   :  { %1444 = vmatpush.bf16.msra.mxu3 %v1904_v36 }
 0xaa4   :  { %v2047_v44 = vpop.eup %2046 }
 0xaa5   :  { %v1092_v47 = vmul.f32 %v2047_v44, %v2033_v14  ;;  %v2049_v49 = vpop.eup %2048 }
 0xaa6   :  { %v1233_v51 = vmul.f32 %v2049_v49, %v2031_v13  ;;  %1445 = vmatpush.bf16.msra.mxu3 %v1903_v39 }
 0xaa7   :  { %v1093_v31 = vpack.c.bf16 %v1092_v47, %v1091_v45  ;;  %v1901_v45 = vld [vmem:[#allocation11 + $0x58] sm:$0xff] }
 0xaa9   :  { %1779 = vmatmul.msk.bf16.vlgmr.msrb.gmra.mxu2 %vm288_vm1, %v1093_v31  ;;  %1781 = vmatmul.msk.bf16.vlgmr.msrb.gmra.mxu3 %vm288_vm1, %v1164_v32  ;;  %v1900_v32 = vld [vmem:[#allocation11 + $0x50] sm:$0xff] }
 0xaaa   :  { %1446 = vmatpush.bf16.msra.mxu3 %v1902_v42 }
 0xaae   :  { %1447 = vmatpush.bf16.msra.mxu3 %v1901_v45 }
 0xab0   :  { %v1237_v48 = vpop.permute.xlu0 %1236 }
 0xab1   :  { %1249 = vmatpush.bf16.msra.mxu2 %v1237_v48 }
 0xab2   :  { %1448 = vmatpush.bf16.msra.mxu3 %v1900_v32 }
 0xac0   :  { %v1230_v24 = vpop.xlane.xlu1 %1229 }
 0xac1   :  { %2050 = vrcp.f32 %v1230_v24  ;;  %v1899_v24 = vld [vmem:[#allocation11 + $0x48] sm:$0xff] }
 0xac2   :  { %1449 = vmatpush.bf16.msra.mxu3 %v1899_v24 }
 0xac7   :  { %v2051_v50 = vpop.eup %2050 }
 0xac8   :  { %v1234_v53 = vmul.f32 %v2051_v50, %v2035_v20 }
 0xaca   :  { %v1235_v56 = vpack.c.bf16 %v1234_v53, %v1233_v51  ;;  %v1898_v51 = vld [vmem:[#allocation11 + $0x40] sm:$0xff] }
 0xacb   :  { %1450 = vmatpush.bf16.msra.mxu3 %v1898_v51 }
 0xacc   :  { %1783 = vmatmul.msk.bf16.vlgmr.msra.gmra.mxu2 %vm288_vm1, %v1235_v56 }
 0xb1c   :  { %v1038_v52 = vpop.f32.mrf.mxu3 }
 0xb24   :  { %v1040_v34 = vpop.f32.mrf.mxu3 }
 0xb2c   :  { %v1109_v57 = vpop.f32.mrf.mxu2  ;;  %v1180_v58 = vpop.f32.mrf.mxu3 }
 0xb34   :  { %v1111_v59 = vpop.f32.mrf.mxu2  ;;  %v1182_v61 = vpop.f32.mrf.mxu3 }
 0xb35   :  { %v1955_v60 = vpack.i.bf16 %v1111_v59, %v1109_v57  ;;  %v1960_v62 = vpack.i.bf16 %v1182_v61, %v1180_v58 }
 0xb37   :  { %1956 = vrot.lane.b32.xlu2 %v1955_v60, %s2290_s14 }
 0xb3f   :  { %1961 = vrot.lane.b32.xlu2 %v1960_v62, %s2298_s1  ;;  %v1794_v62 = vld [vmem:[%s2643_s5 + $0x1] sm:$0x1] }
 0xb4f   :  { %v1251_v0 = vpop.f32.mrf.mxu2 }
 0xb57   :  { %v1253_v8 = vpop.f32.mrf.mxu2 }
 0xb58   :  { %v1965_v1 = vpack.i.bf16 %v1253_v8, %v1251_v0 }
 0xb5a   :  { %1966 = vrot.lane.b32.xlu0 %v1965_v1, %s2312_s24 }
 0xb91   :  { %v1957_v3 = vpop.permute.xlu2 %1956 }
 0xb92   :  { %v1959_v5 = vunpack.i.h.bf16 %v1957_v3  ;;  %v1958_v6 = vunpack.i.l.bf16 %v1957_v3 }
 0xb94   :  { %v1281_v12 = vsel %vm263_vm0, %v1040_v34, %v1959_v5  ;;  %v1280_v13 = vsel %vm263_vm0, %v1038_v52, %v1958_v6 }
 0xb99   :  { %v1962_v4 = vpop.permute.xlu2 %1961 }
 0xb9a   :  { %v1964_v7 = vunpack.i.h.bf16 %v1962_v4  ;;  %v1963_v10 = vunpack.i.l.bf16 %v1962_v4 }
 0xb9c   :  { %v1282_v15 = vsel %vm288_vm1, %v1280_v13, %v1963_v10  ;;  %v1283_v16 = vsel %vm288_vm1, %v1281_v12, %v1964_v7  ;;  %v1913_v7 = vld [vmem:[#allocation13 + $0x78] sm:$0xff]  ;;  %v1912_v10 = vld [vmem:[#allocation13 + $0x70] sm:$0xff]  ;;  %v1910_v12 = vld [vmem:[#allocation13 + $0x60] sm:$0xff] }
 0xb9d   :  { %1546 = vmatpush.bf16.msrb.mxu0 %v1913_v7  ;;  %v1909_v13 = vld [vmem:[#allocation13 + $0x58] sm:$0xff] }
 0xba1   :  { %1547 = vmatpush.bf16.msrb.mxu0 %v1912_v10 }
 0xbcc   :  { %v1967_v11 = vpop.permute.xlu0 %1966 }
 0xbcd   :  { %v1969_v17 = vunpack.i.h.bf16 %v1967_v11  ;;  %v1968_v14 = vunpack.i.l.bf16 %v1967_v11  ;;  %v1911_v11 = vld [vmem:[#allocation13 + $0x68] sm:$0xff] }
 0xbce   :  { %1548 = vmatpush.bf16.msrb.mxu0 %v1911_v11  ;;  %v1861_v11 = vld [vmem:[%s2649_s11 + $0x1] sm:$0x1] }
 0xbcf   :  { %v1285_v18 = vsel %vm573_vm2, %v1283_v16, %v1969_v17  ;;  %v1284_v19 = vsel %vm573_vm2, %v1282_v15, %v1968_v14  ;;  %v1908_v17 = vld [vmem:[#allocation13 + $0x50] sm:$0xff]  ;;  %v1907_v14 = vld [vmem:[#allocation13 + $0x48] sm:$0xff]  ;;  %v1906_v15 = vld [vmem:[#allocation13 + $0x40] sm:$0xff] }
 0xbd0   :  { %v1286_v20 = vpack.c.bf16 %v1285_v18, %v1284_v19  ;;  %v1977_v16 = vld [vmem:[%s2646_s8 + $0x1] ss:$0 sm:$0xff] }
 0xbd2   :  { %1793 = vmatmul.msk.bf16.vlgmr.msrb.gmra.mxu1 %vm597_vm3, %v1286_v20  ;;  %1549 = vmatpush.bf16.msrb.mxu0 %v1910_v12 }
 0xbd6   :  { %1550 = vmatpush.bf16.msrb.mxu0 %v1909_v13 }
 0xbda   :  { %1551 = vmatpush.bf16.msrb.mxu0 %v1908_v17 }
 0xbde   :  { %1552 = vmatpush.bf16.msrb.mxu0 %v1907_v14  ;;  %v1979_v14 = vld [vmem:[#allocation14 + $0x1] ss:$0 sm:$0xff] }
 0xbe2   :  { %1553 = vmatpush.bf16.msrb.mxu0 %v1906_v15 }
 0xc4f   :  { %v1321_v21 = vpop.f32.mrf.mxu1 }
 0xc50   :  { %v1322_v23 = vadd.f32 %v1975_v22, %v1321_v21 }
 0xc52   :  { %v1326_v27 = vadd.f32 %v1322_v23, %v2536_v55 }
 0xc57   :  { %v1323_v25 = vpop.f32.mrf.mxu1 }
 0xc58   :  { %v1324_v26 = vadd.f32 %v1975_v22, %v1323_v25 }
 0xc5a   :  { %v1327_v28 = vadd.f32 %v1324_v26, %v2534_v54 }
 0xc5c   :  { %v1328_v29 = vadd.f32 %v1327_v28, %v1326_v27 }
 0xc5e   :  { %v1329_v30 = vrot.slane %v1328_v29, 4 }
 0xc60   :  { %v1330_v35 = vadd.f32 %v1329_v30, %v1328_v29 }
 0xc62   :  { %v1331_v63 = vrot.slane %v1330_v35, 2 }
 0xc64   :  { %v1332_v37 = vadd.f32 %v1331_v63, %v1330_v35 }
 0xc66   :  { %v1333_v38 = vrot.slane %v1332_v37, 1 }
 0xc68   :  { %v1334_v40 = vadd.f32 %v1333_v38, %v1332_v37 }
 0xc6a   :  { %v1335_v41 = vmul.f32 0.0625, %v1334_v40 }
 0xc6c   :  { %v1336_v43 = vsub.f32 %v1326_v27, %v1335_v41  ;;  %v1337_v44 = vsub.f32 %v1327_v28, %v1335_v41 }
 0xc6e   :  { %v1338_v55 = vmul.f32 %v1336_v43, %v1336_v43  ;;  %v1339_v54 = vmul.f32 %v1337_v44, %v1337_v44 }
 0xc70   :  { %v1340_v46 = vadd.f32 %v1339_v54, %v1338_v55  ;;  %v1978_v55 = vld [vmem:[%s2648_s10 + $0x1] ss:$0 sm:$0xff] }
 0xc72   :  { %v1341_v47 = vrot.slane %v1340_v46, 4 }
 0xc74   :  { %v1342_v31 = vadd.f32 %v1341_v47, %v1340_v46 }
 0xc76   :  { %v1343_v48 = vrot.slane %v1342_v31, 2 }
 0xc78   :  { %v1344_v49 = vadd.f32 %v1343_v48, %v1342_v31 }
 0xc7a   :  { %v1345_v50 = vrot.slane %v1344_v49, 1 }
 0xc7c   :  { %v1346_v53 = vadd.f32 %v1345_v50, %v1344_v49 }
 0xc7e   :  { %v1347_v56 = vmul.f32 0.0625, %v1346_v53 }
 0xc80   :  { %v1348_v52 = vadd.f32 1e-05, %v1347_v56 }
 0xc82   :  { %2052 = vrsqrt.f32 %v1348_v52  ;;  %vm1355_vm11 = vweird.f32 %v1348_v52 }
 0xc88   :  { %v2053_v34 = vpop.eup %2052 }
 0xc89   :  { %v1350_v57 = vmul.f32 %v2053_v34, %v1348_v52  ;;  %vm1356_vm10 = vweird.f32 %v2053_v34 }
 0xc8a   :  { %vm1357_vm12 = vmor %vm1355_vm11, %vm1356_vm10 }
 0xc8b   :  { %v1351_v58 = vmul.f32 %v2053_v34, %v1350_v57 }
 0xc8d   :  { %v1352_v59 = vmul.f32 0.5, %v1351_v58 }
 0xc8f   :  { %v1353_v60 = vsub.f32 1.5, %v1352_v59 }
 0xc91   :  { %v1354_v61 = vmul.f32 %v2053_v34, %v1353_v60 }
 0xc93   :  { %v1358_v0 = vsel %vm1357_vm12, %v2053_v34, %v1354_v61 }
 0xc94   :  { %v1361_v8 = vmul.f32 %v1794_v62, %v1358_v0 }
 0xc96   :  { %v1362_v1 = vperm.slane %v1361_v8, 0 }
 0xc98   :  { %v1363_v2 = vmul.f32 %v1362_v1, %v1336_v43  ;;  %v1364_v3 = vmul.f32 %v1362_v1, %v1337_v44 }
 0xc9a   :  { %v1371_v4 = vadd.f32 %v1976_v9, %v1364_v3  ;;  %v1370_v5 = vadd.f32 %v1976_v9, %v1363_v2 }
 0xc9c   :  { %v1372_v6 = vpack.c.bf16 %v1371_v4, %v1370_v5 }
 0xc9e   :  { %1451 = vmatmul.bf16.vlgmr.msra.gmra.mxu3 %v1372_v6 }
 0xd21   :  { %v1452_v18 = vpop.f32.mrf.mxu3 }
 0xd22   :  { %v1453_v19 = vadd.f32 %v1977_v16, %v1452_v18 }
 0xd24   :  { %v1459_v20 = vmul.f32 %v1453_v19, %v1453_v19  ;;  %v1457_v38 = vmul.f32 0.5, %v1453_v19 }
 0xd26   :  { %v1461_v21 = vmul.f32 %v1459_v20, %v1453_v19 }
 0xd28   :  { %v1463_v22 = vmul.f32 0.044715, %v1461_v21 }
 0xd29   :  { %v1454_v23 = vpop.f32.mrf.mxu3 }
 0xd2a   :  { %v1465_v25 = vadd.f32 %v1463_v22, %v1453_v19  ;;  %v1455_v26 = vadd.f32 %v1977_v16, %v1454_v23 }
 0xd2c   :  { %v1460_v27 = vmul.f32 %v1455_v26, %v1455_v26  ;;  %v1467_v28 = vmul.f32 0.7978846, %v1465_v25  ;;  %v1458_v39 = vmul.f32 0.5, %v1455_v26 }
 0xd2e   :  { %v1462_v29 = vmul.f32 %v1460_v27, %v1455_v26  ;;  %2054 = vtanh.f32 %v1467_v28 }
 0xd30   :  { %v1464_v30 = vmul.f32 0.044715, %v1462_v29 }
 0xd32   :  { %v1466_v33 = vadd.f32 %v1464_v30, %v1455_v26 }
 0xd34   :  { %v1468_v35 = vmul.f32 0.7978846, %v1466_v33  ;;  %v2055_v63 = vpop.eup %2054 }
 0xd35   :  { %v1471_v36 = vadd.f32 1.0, %v2055_v63 }
 0xd36   :  { %2056 = vtanh.f32 %v1468_v35 }
 0xd37   :  { %v1473_v41 = vmul.f32 %v1471_v36, %v1457_v38 }
 0xd3c   :  { %v2057_v37 = vpop.eup %2056 }
 0xd3d   :  { %v1472_v40 = vadd.f32 1.0, %v2057_v37 }
 0xd3f   :  { %v1474_v42 = vmul.f32 %v1472_v40, %v1458_v39 }
 0xd41   :  { %v1475_v43 = vpack.c.bf16 %v1474_v42, %v1473_v41 }
 0xd43   :  { %1554 = vmatmul.bf16.vlgmr.msrb.gmra.mxu0 %v1475_v43 }
 0xdc0   :  { %v1555_v44 = vpop.f32.mrf.mxu0 }
 0xdc1   :  { %v1556_v54 = vadd.f32 %v1978_v55, %v1555_v44 }
 0xdc3   :  { %v1560_v47 = vadd.f32 %v1556_v54, %v1370_v5 }
 0xdc8   :  { %v1557_v45 = vpop.f32.mrf.mxu0 }
 0xdc9   :  { %v1558_v46 = vadd.f32 %v1978_v55, %v1557_v45 }
 0xdcb   :  { %v1561_v32 = vadd.f32 %v1558_v46, %v1371_v4 }
 0xdcd   :  { %v1562_v31 = vadd.f32 %v1561_v32, %v1560_v47 }
 0xdcf   :  { %v1563_v48 = vrot.slane %v1562_v31, 4 }
 0xdd1   :  { %v1564_v24 = vadd.f32 %v1563_v48, %v1562_v31 }
 0xdd3   :  { %v1565_v49 = vrot.slane %v1564_v24, 2 }
 0xdd5   :  { %v1566_v50 = vadd.f32 %v1565_v49, %v1564_v24 }
 0xdd7   :  { %v1567_v51 = vrot.slane %v1566_v50, 1 }
 0xdd9   :  { %v1568_v53 = vadd.f32 %v1567_v51, %v1566_v50 }
 0xddb   :  { %v1569_v56 = vmul.f32 0.0625, %v1568_v53 }
 0xddd   :  { %v1570_v52 = vsub.f32 %v1560_v47, %v1569_v56  ;;  %v1571_v34 = vsub.f32 %v1561_v32, %v1569_v56 }
 0xddf   :  { %v1572_v57 = vmul.f32 %v1570_v52, %v1570_v52  ;;  %v1573_v58 = vmul.f32 %v1571_v34, %v1571_v34 }
 0xde1   :  { %v1574_v59 = vadd.f32 %v1573_v58, %v1572_v57 }
 0xde3   :  { %v1575_v60 = vrot.slane %v1574_v59, 4 }
 0xde5   :  { %v1576_v61 = vadd.f32 %v1575_v60, %v1574_v59 }
 0xde7   :  { %v1577_v62 = vrot.slane %v1576_v61, 2 }
 0xde9   :  { %v1578_v0 = vadd.f32 %v1577_v62, %v1576_v61 }
 0xdeb   :  { %v1579_v8 = vrot.slane %v1578_v0, 1 }
 0xded   :  { %v1580_v1 = vadd.f32 %v1579_v8, %v1578_v0 }
 0xdef   :  { %v1581_v9 = vmul.f32 0.0625, %v1580_v1 }
 0xdf1   :  { %v1582_v2 = vadd.f32 1e-05, %v1581_v9 }
 0xdf3   :  { %2058 = vrsqrt.f32 %v1582_v2  ;;  %vm1589_vm14 = vweird.f32 %v1582_v2 }
 0xdf9   :  { %v2059_v3 = vpop.eup %2058 }
 0xdfa   :  { %v1584_v4 = vmul.f32 %v2059_v3, %v1582_v2  ;;  %vm1590_vm13 = vweird.f32 %v2059_v3 }
 0xdfb   :  { %vm1591_vm15 = vmor %vm1589_vm14, %vm1590_vm13 }
 0xdfc   :  { %v1585_v5 = vmul.f32 %v2059_v3, %v1584_v4 }
 0xdfe   :  { %v1586_v6 = vmul.f32 0.5, %v1585_v5 }
 0xe00   :  { %v1587_v7 = vsub.f32 1.5, %v1586_v6 }
 0xe02   :  { %v1588_v10 = vmul.f32 %v2059_v3, %v1587_v7 }
 0xe04   :  { %v1592_v12 = vsel %vm1591_vm15, %v2059_v3, %v1588_v10 }
 0xe05   :  { %v1595_v13 = vmul.f32 %v1861_v11, %v1592_v12 }
 0xe07   :  { %v1596_v17 = vperm.slane %v1595_v13, 0 }
 0xe09   :  { %v1598_v15 = vmul.f32 %v1596_v17, %v1571_v34  ;;  %v1597_v16 = vmul.f32 %v1596_v17, %v1570_v52 }
 0xe0b   :  { %v1604_v18 = vadd.f32 %v1979_v14, %v1597_v16  ;;  %v1605_v19 = vadd.f32 %v1979_v14, %v1598_v15 }
 0xe0d   :  { %1606 = vst [vmem:[#allocation16] sm:$0xff] %v1604_v18 }
 0xe0e   :  { %1607 = vst [vmem:[#allocation16 + $0x8] sm:$0xff] %v1605_v19 }
 0xe0f   :  { %1620 = dma.vmem_to_hbm [thread:$0]  %s1613_s18, 256, %s1615_s21, [#allocation4], %s2289_s30, %s2289_s30, %s2290_s14  }
 0xe10   :  { %2286 = dma.done.wait [#allocation4], 256  }
 0xe11   :  { %2287 = vsyncadd [#allocation4], 4294967040 }
 0xe12   :  { %1625 = vsyncpa [#allocation3], 1 }
 0xe13   :  { %1626 = vsyncpa [#allocation6], 1 }
 0xe14   :  { %1627 = vsyncpa [#allocation9], 1 }
 0xe15   :  { %1628 = vsyncpa [#allocation12], 1 }
 0xe16   :  { %1629 = vsyncpa [#allocation15], 1 }
 0xe17   :  { %1630 = vsyncpa [#allocation4], 1 }

</bundles_post_ra>
